<compile_context>
chip_gen: v7x
topology: tpu7x:2x2x1
jax: 0.10.0
libtpu: 0.0.40
codegen_flags: <defaults>
</compile_context>

<pallas_src>
import functools

import jax
import jax.numpy as jnp
from jax.experimental import pallas as pl
from jax.experimental.pallas import tpu as pltpu


# ------------------------------ fused Fuser kernel ------------------------------
def _fuser_kernel(x_ref, projck_ref, wconv_ref, bconv_ref,
                  wih_ref, whh_ref, bcomb_ref, out_ref, *, K):
    """
    x_ref      : (B, D, S, E) f32
    projck_ref : (E, 2E)      bf16  [proj_c | proj_k]  (extractor proxy weights)
    wconv_ref  : (K, E, Co)   bf16  conv weight, one (E, Co) slab per kernel row
    bconv_ref  : (1, Co)      f32
    wih_ref    : (E, 8H)      bf16  input->gate weights, both directions, columns
                                    gate-type interleaved [i_f,i_b,f_f,f_b,g_f,g_b,o_f,o_b]
    whh_ref    : (2H, 8H)     bf16  block-diagonal recurrent weights (same column layout)
    bcomb_ref  : (1, 8H)      f32   b_ih + b_hh, same column layout
    out_ref    : (B, 2E + 2H) f32   [CNN_Text features | summed BiLSTM hidden]
    """
    B, D, S, E = x_ref.shape
    Co = bconv_ref.shape[1]
    H = E // 2
    G = 8 * H                    # fused gate width: 4 gates x 2 directions
    T = D - K + 1

    # ---- extractor proxy: mean-pool over words + fused linear projections ----
    # TODO(synk): `extractor` is an external module passed into Fuser.__init__ (not
    # defined in the source); mean-pool + linear proxy produces (ec, ek) here.
    xa = x_ref[...].reshape(B * D, S, E)
    pooled = jnp.mean(xa, axis=1)                                   # (B*D, E) f32
    mck = jnp.dot(pooled.astype(jnp.bfloat16), projck_ref[...],
                  preferred_element_type=jnp.float32)               # (B*D, 2E) f32
    mc = mck[:, :E].reshape(B, D, E)                                # CNN branch input
    mk = mck[:, E:]                                                 # LSTM branch input (B*D, E)

    # ---- CNN_Text: conv (K, E) as K accumulated matmuls + ReLU + global max-pool ----
    acc = jnp.zeros((B * T, Co), jnp.float32)
    for k in range(K):                                              # static unroll (K small)
        win = mc[:, k:k + T, :].reshape(B * T, E).astype(jnp.bfloat16)
        acc = acc + jnp.dot(win, wconv_ref[k],
                            preferred_element_type=jnp.float32)
    act = jnp.maximum(acc + bconv_ref[...], 0.0)                    # ReLU (f32, VPU)
    cnn_out = jnp.max(act.reshape(B, T, Co), axis=1)                # (B, Co) max_pool1d
    # nn.Dropout: identity in eval / inference mode.

    # ---- bidirectional LSTM + sum over time ----
    # Hoisted, time-independent input projection for BOTH directions: one matmul.
    xg = jnp.dot(mk.astype(jnp.bfloat16), wih_ref[...],
                 preferred_element_type=jnp.float32)                # (B*D, 8H)
    xg = (xg + bcomb_ref[...]).reshape(B, D, G)

    lane = jax.lax.broadcasted_iota(jnp.int32, (B, G), 1)
    fwd_mask = (lane % (2 * H)) < H               # forward-direction lanes of each gate
    tanh_mask = (lane >= 4 * H) & (lane < 6 * H)  # "g" gate lanes (both directions)

    whh = whh_ref[...]                            # (2H, 8H) bf16, single load
    h = jnp.zeros((B, 2 * H), jnp.float32)        # [h_fwd | h_bwd]
    c = jnp.zeros((B, 2 * H), jnp.float32)
    hsum = jnp.zeros((B, 2 * H), jnp.float32)
    for t in range(D):                            # static unroll of the recurrence
        # forward lanes read timestep t, backward lanes read timestep D-1-t
        x_t = jnp.where(fwd_mask, xg[:, t, :], xg[:, D - 1 - t, :])           # (B, 8H)
        gates = x_t + jnp.dot(h.astype(jnp.bfloat16), whh,
                              preferred_element_type=jnp.float32)             # (B, 8H)
        ga = jnp.where(tanh_mask, jnp.tanh(gates), jax.nn.sigmoid(gates))     # full-width
        i_g = ga[:, 0:2 * H]
        f_g = ga[:, 2 * H:4 * H]
        g_g = ga[:, 4 * H:6 * H]
        o_g = ga[:, 6 * H:8 * H]
        c = f_g * c + i_g * g_g
        h = o_g * jnp.tanh(c)
        hsum = hsum + h

    # single lane-dense store of the fused (B, 3E) output
    out_ref[...] = jnp.concatenate([cnn_out, hsum], axis=1).astype(out_ref.dtype)


# ------------------------------ weight preparation ------------------------------
def _prep_params(params):
    """Rearrange PyTorch-layout weights into the fused-kernel layouts (trace-time)."""
    E = params["proj_c"].shape[0]
    H = E // 2
    Co = params["w_conv"].shape[0]
    bf16 = jnp.bfloat16

    proj_ck = jnp.concatenate([params["proj_c"], params["proj_k"]], axis=1)    # (E, 2E)
    # nn.Conv2d weight (Co, 1, K, E) -> (K, E, Co): one (E, Co) matmul slab per row
    w_conv_r = jnp.transpose(params["w_conv"][:, 0], (1, 2, 0))
    b_conv = params["b_conv"].reshape(1, Co).astype(jnp.float32)

    def interleave(wf, wb):          # (rows, 4H) x2 -> (rows, 8H), gate-type interleaved
        rows = wf.shape[0]
        return jnp.stack([wf.reshape(rows, 4, H), wb.reshape(rows, 4, H)],
                         axis=2).reshape(rows, 8 * H)

    wih_comb = interleave(params["wih_f"], params["wih_b"])                    # (E, 8H)
    b_comb = interleave(params["b_f"], params["b_b"]).astype(jnp.float32)      # (1, 8H)

    zero = jnp.zeros((H, H), jnp.float32)
    blocks = []
    for g in range(4):               # per gate type: block_diag(whh_f_g, whh_b_g)
        wfg = params["whh_f"][:, g * H:(g + 1) * H]
        wbg = params["whh_b"][:, g * H:(g + 1) * H]
        blocks.append(jnp.concatenate(
            [jnp.concatenate([wfg, zero], axis=1),
             jnp.concatenate([zero, wbg], axis=1)], axis=0))                   # (2H, 2H)
    whh_comb = jnp.concatenate(blocks, axis=1)                                 # (2H, 8H)

    return dict(
        proj_ck=proj_ck.astype(bf16),
        w_conv_r=w_conv_r.astype(bf16),
        b_conv=b_conv,
        wih_comb=wih_comb.astype(bf16),
        whh_comb=whh_comb.astype(bf16),
        b_comb=b_comb,
    )


# ---------------------------------- Fuser API ------------------------------------
def fuser_forward(x, params):
    """x: (B, D, S, E) -> (B, 3*E), one fused pallas_call."""
    B, D, S, E = x.shape
    K = int(params["K"])
    assert D >= K, "conv kernel height K must not exceed the number of sentences D"
    H = E // 2
    Co = 2 * E
    p = _prep_params(params)
    vmem = pl.BlockSpec(memory_space=pltpu.MemorySpace.VMEM)
    # NOTE: no grid — the whole problem fits a single TensorCore's VMEM at these shapes.
    # Add a parallel batch grid (dimension_semantics=("parallel",)) once B grows, to use
    # v7x's second TensorCore.
    return pl.pallas_call(
        functools.partial(_fuser_kernel, K=K),
        out_shape=jax.ShapeDtypeStruct((B, Co + 2 * H), jnp.float32),
        in_specs=[vmem] * 7,
        out_specs=vmem,
    )(x, p["proj_ck"], p["w_conv_r"], p["b_conv"],
      p["wih_comb"], p["whh_comb"], p["b_comb"])


def init_params(key, E, K):
    H = E // 2
    Co = 2 * E
    ks = jax.random.split(key, 10)

    def u(k, shape, scale):
        return jax.random.uniform(k, shape, jnp.float32, -scale, scale)

    conv_scale = 1.0 / (K * E) ** 0.5
    lstm_scale = 1.0 / H ** 0.5
    return dict(
        K=K,
        proj_c=u(ks[0], (E, E), 1.0 / E ** 0.5),
        proj_k=u(ks[1], (E, E), 1.0 / E ** 0.5),
        # nn.Conv2d(1, Co, (K, E)): weight (Co, 1, K, E), bias (Co,)
        w_conv=u(ks[2], (Co, 1, K, E), conv_scale),
        b_conv=u(ks[3], (Co,), conv_scale),
        # nn.LSTM(E, H, bidirectional): weights stored pre-transposed;
        # b_f / b_b represent b_ih + b_hh (sum of the two PyTorch biases).
        wih_f=u(ks[4], (E, 4 * H), lstm_scale),
        whh_f=u(ks[5], (H, 4 * H), lstm_scale),
        b_f=u(ks[6], (1, 4 * H), lstm_scale),
        wih_b=u(ks[7], (E, 4 * H), lstm_scale),
        whh_b=u(ks[8], (H, 4 * H), lstm_scale),
        b_b=u(ks[9], (1, 4 * H), lstm_scale),
    )


if __name__ == "__main__":
    key = jax.random.PRNGKey(0)
    B, D, S, E = 2, 8, 6, 32      # batch, docs/sentences, words-per-sentence, hidden_size
    K_sent = 4                    # args.sentence_len -> conv kernel height K
    kx, kp = jax.random.split(key)
    x = jax.random.normal(kx, (B, D, S, E), jnp.float32)
    params = init_params(kp, E, K_sent)
    out = fuser_forward(x, params)
    jax.block_until_ready(out)
    assert out.shape == (B, 3 * E) and out.dtype == jnp.float32
    print("KERNEL_OK")
</pallas_src>

<mosaic_0001>
module attributes {stable_mosaic.version = 11 : i64} {
  func.func @_fuser_kernel(%arg0: memref<2x8x6x32xf32, #tpu.memory_space<vmem>>, %arg1: memref<32x64xbf16, #tpu.memory_space<vmem>>, %arg2: memref<4x32x64xbf16, #tpu.memory_space<vmem>>, %arg3: memref<1x64xf32, #tpu.memory_space<vmem>>, %arg4: memref<32x128xbf16, #tpu.memory_space<vmem>>, %arg5: memref<32x128xbf16, #tpu.memory_space<vmem>>, %arg6: memref<1x128xf32, #tpu.memory_space<vmem>>, %arg7: memref<2x96xf32, #tpu.memory_space<vmem>>) attributes {dimension_semantics = [], scalar_prefetch = 0 : i64, scratch_operands = 0 : i64, tpu.core_type = #tpu.core_type<tc>} {
    %c0 = arith.constant 0 : index
    %c0_0 = arith.constant 0 : index
    %c0_1 = arith.constant 0 : index
    %c0_2 = arith.constant 0 : index
    %0 = vector.load %arg0[%c0, %c0_0, %c0_1, %c0_2] : memref<2x8x6x32xf32, #tpu.memory_space<vmem>>, vector<2x8x6x32xf32>
    %1 = vector.shape_cast %0 : vector<2x8x6x32xf32> to vector<16x6x32xf32>
    %cst = arith.constant dense<0.000000e+00> : vector<16x32xf32>
    %2 = vector.multi_reduction <add>, %1, %cst [1] : vector<16x6x32xf32> to vector<16x32xf32>
    %cst_3 = arith.constant 6.000000e+00 : f32
    %3 = vector.broadcast %cst_3 : f32 to vector<16x32xf32>
    %4 = arith.divf %2, %3 : vector<16x32xf32>
    %5 = arith.truncf %4 : vector<16x32xf32> to vector<16x32xbf16>
    %c0_4 = arith.constant 0 : index
    %c0_5 = arith.constant 0 : index
    %6 = vector.load %arg1[%c0_4, %c0_5] : memref<32x64xbf16, #tpu.memory_space<vmem>>, vector<32x64xbf16>
    %cst_6 = arith.constant dense<0.000000e+00> : vector<16x64xf32>
    %7 = tpu.matmul %5, %6, %cst_6 {dimension_numbers = #tpu.dot_dimension_numbers<[1], [0], [0], [1], [0, 0, 1, 1], [], []>} : vector<16x32xbf16>, vector<32x64xbf16>, vector<16x64xf32> -> vector<16x64xf32>
    %8 = vector.extract_strided_slice %7 {offsets = [0, 0], sizes = [16, 32], strides = [1, 1]} : vector<16x64xf32> to vector<16x32xf32>
    %9 = vector.shape_cast %8 : vector<16x32xf32> to vector<2x8x32xf32>
    %10 = vector.extract_strided_slice %7 {offsets = [0, 32], sizes = [16, 32], strides = [1, 1]} : vector<16x64xf32> to vector<16x32xf32>
    %cst_7 = arith.constant 0.000000e+00 : f32
    %11 = vector.broadcast %cst_7 : f32 to vector<10x64xf32>
    %12 = vector.extract_strided_slice %9 {offsets = [0, 0, 0], sizes = [2, 5, 32], strides = [1, 1, 1]} : vector<2x8x32xf32> to vector<2x5x32xf32>
    %13 = vector.shape_cast %12 : vector<2x5x32xf32> to vector<10x32xf32>
    %14 = arith.truncf %13 : vector<10x32xf32> to vector<10x32xbf16>
    %c0_8 = arith.constant 0 : index
    %c0_9 = arith.constant 0 : index
    %c0_10 = arith.constant 0 : index
    %15 = vector.load %arg2[%c0_8, %c0_9, %c0_10] : memref<4x32x64xbf16, #tpu.memory_space<vmem>>, vector<1x32x64xbf16>
    %16 = vector.shape_cast %15 : vector<1x32x64xbf16> to vector<32x64xbf16>
    %cst_11 = arith.constant dense<0.000000e+00> : vector<10x64xf32>
    %17 = tpu.matmul %14, %16, %cst_11 {dimension_numbers = #tpu.dot_dimension_numbers<[1], [0], [0], [1], [0, 0, 1, 1], [], []>} : vector<10x32xbf16>, vector<32x64xbf16>, vector<10x64xf32> -> vector<10x64xf32>
    %18 = arith.addf %11, %17 : vector<10x64xf32>
    %19 = vector.extract_strided_slice %9 {offsets = [0, 1, 0], sizes = [2, 5, 32], strides = [1, 1, 1]} : vector<2x8x32xf32> to vector<2x5x32xf32>
    %20 = vector.shape_cast %19 : vector<2x5x32xf32> to vector<10x32xf32>
    %21 = arith.truncf %20 : vector<10x32xf32> to vector<10x32xbf16>
    %c1 = arith.constant 1 : index
    %c0_12 = arith.constant 0 : index
    %c0_13 = arith.constant 0 : index
    %22 = vector.load %arg2[%c1, %c0_12, %c0_13] : memref<4x32x64xbf16, #tpu.memory_space<vmem>>, vector<1x32x64xbf16>
    %23 = vector.shape_cast %22 : vector<1x32x64xbf16> to vector<32x64xbf16>
    %cst_14 = arith.constant dense<0.000000e+00> : vector<10x64xf32>
    %24 = tpu.matmul %21, %23, %cst_14 {dimension_numbers = #tpu.dot_dimension_numbers<[1], [0], [0], [1], [0, 0, 1, 1], [], []>} : vector<10x32xbf16>, vector<32x64xbf16>, vector<10x64xf32> -> vector<10x64xf32>
    %25 = arith.addf %18, %24 : vector<10x64xf32>
    %26 = vector.extract_strided_slice %9 {offsets = [0, 2, 0], sizes = [2, 5, 32], strides = [1, 1, 1]} : vector<2x8x32xf32> to vector<2x5x32xf32>
    %27 = vector.shape_cast %26 : vector<2x5x32xf32> to vector<10x32xf32>
    %28 = arith.truncf %27 : vector<10x32xf32> to vector<10x32xbf16>
    %c2 = arith.constant 2 : index
    %c0_15 = arith.constant 0 : index
    %c0_16 = arith.constant 0 : index
    %29 = vector.load %arg2[%c2, %c0_15, %c0_16] : memref<4x32x64xbf16, #tpu.memory_space<vmem>>, vector<1x32x64xbf16>
    %30 = vector.shape_cast %29 : vector<1x32x64xbf16> to vector<32x64xbf16>
    %cst_17 = arith.constant dense<0.000000e+00> : vector<10x64xf32>
    %31 = tpu.matmul %28, %30, %cst_17 {dimension_numbers = #tpu.dot_dimension_numbers<[1], [0], [0], [1], [0, 0, 1, 1], [], []>} : vector<10x32xbf16>, vector<32x64xbf16>, vector<10x64xf32> -> vector<10x64xf32>
    %32 = arith.addf %25, %31 : vector<10x64xf32>
    %33 = vector.extract_strided_slice %9 {offsets = [0, 3, 0], sizes = [2, 5, 32], strides = [1, 1, 1]} : vector<2x8x32xf32> to vector<2x5x32xf32>
    %34 = vector.shape_cast %33 : vector<2x5x32xf32> to vector<10x32xf32>
    %35 = arith.truncf %34 : vector<10x32xf32> to vector<10x32xbf16>
    %c3 = arith.constant 3 : index
    %c0_18 = arith.constant 0 : index
    %c0_19 = arith.constant 0 : index
    %36 = vector.load %arg2[%c3, %c0_18, %c0_19] : memref<4x32x64xbf16, #tpu.memory_space<vmem>>, vector<1x32x64xbf16>
    %37 = vector.shape_cast %36 : vector<1x32x64xbf16> to vector<32x64xbf16>
    %cst_20 = arith.constant dense<0.000000e+00> : vector<10x64xf32>
    %38 = tpu.matmul %35, %37, %cst_20 {dimension_numbers = #tpu.dot_dimension_numbers<[1], [0], [0], [1], [0, 0, 1, 1], [], []>} : vector<10x32xbf16>, vector<32x64xbf16>, vector<10x64xf32> -> vector<10x64xf32>
    %39 = arith.addf %32, %38 : vector<10x64xf32>
    %c0_21 = arith.constant 0 : index
    %c0_22 = arith.constant 0 : index
    %40 = vector.load %arg3[%c0_21, %c0_22] : memref<1x64xf32, #tpu.memory_space<vmem>>, vector<1x64xf32>
    %41 = vector.broadcast %40 : vector<1x64xf32> to vector<10x64xf32>
    %42 = arith.addf %39, %41 : vector<10x64xf32>
    %cst_23 = arith.constant 0.000000e+00 : f32
    %43 = vector.broadcast %cst_23 : f32 to vector<10x64xf32>
    %44 = arith.maximumf %42, %43 : vector<10x64xf32>
    %45 = vector.shape_cast %44 : vector<10x64xf32> to vector<2x5x64xf32>
    %cst_24 = arith.constant dense<0xFF800000> : vector<2x64xf32>
    %46 = vector.multi_reduction <maximumf>, %45, %cst_24 [1] : vector<2x5x64xf32> to vector<2x64xf32>
    %47 = arith.truncf %10 : vector<16x32xf32> to vector<16x32xbf16>
    %c0_25 = arith.constant 0 : index
    %c0_26 = arith.constant 0 : index
    %48 = vector.load %arg4[%c0_25, %c0_26] : memref<32x128xbf16, #tpu.memory_space<vmem>>, vector<32x128xbf16>
    %cst_27 = arith.constant dense<0.000000e+00> : vector<16x128xf32>
    %49 = tpu.matmul %47, %48, %cst_27 {dimension_numbers = #tpu.dot_dimension_numbers<[1], [0], [0], [1], [0, 0, 1, 1], [], []>} : vector<16x32xbf16>, vector<32x128xbf16>, vector<16x128xf32> -> vector<16x128xf32>
    %c0_28 = arith.constant 0 : index
    %c0_29 = arith.constant 0 : index
    %50 = vector.load %arg6[%c0_28, %c0_29] : memref<1x128xf32, #tpu.memory_space<vmem>>, vector<1x128xf32>
    %51 = vector.broadcast %50 : vector<1x128xf32> to vector<16x128xf32>
    %52 = arith.addf %49, %51 : vector<16x128xf32>
    %53 = vector.shape_cast %52 : vector<16x128xf32> to vector<2x8x128xf32>
    %54 = tpu.iota {dimensions = array<i32: 1>} : vector<2x128xi32>
    %c32_i32 = arith.constant 32 : i32
    %c0_i32 = arith.constant 0 : i32
    %55 = arith.cmpi eq, %c32_i32, %c0_i32 : i32
    %c1_i32 = arith.constant 1 : i32
    %56 = arith.select %55, %c1_i32, %c32_i32 : i32
    %57 = vector.broadcast %56 : i32 to vector<2x128xi32>
    %58 = arith.remsi %54, %57 : vector<2x128xi32>
    %c0_i32_30 = arith.constant 0 : i32
    %59 = vector.broadcast %c0_i32_30 : i32 to vector<2x128xi32>
    %60 = arith.cmpi ne, %58, %59 : vector<2x128xi32>
    %c0_i32_31 = arith.constant 0 : i32
    %61 = vector.broadcast %c0_i32_31 : i32 to vector<2x128xi32>
    %62 = arith.cmpi slt, %58, %61 : vector<2x128xi32>
    %c0_i32_32 = arith.constant 0 : i32
    %63 = arith.cmpi slt, %56, %c0_i32_32 : i32
    %64 = vector.broadcast %63 : i1 to vector<2x128xi1>
    %65 = vector.broadcast %64 : vector<2x128xi1> to vector<2x128xi1>
    %66 = arith.xori %62, %65 : vector<2x128xi1>
    %67 = arith.andi %66, %60 : vector<2x128xi1>
    %68 = vector.broadcast %56 : i32 to vector<2x128xi32>
    %69 = arith.addi %58, %68 : vector<2x128xi32>
    %70 = arith.select %67, %69, %58 : vector<2x128xi1>, vector<2x128xi32>
    %c16_i32 = arith.constant 16 : i32
    %71 = vector.broadcast %c16_i32 : i32 to vector<2x128xi32>
    %72 = arith.cmpi slt, %70, %71 : vector<2x128xi32>
    %c64_i32 = arith.constant 64 : i32
    %73 = vector.broadcast %c64_i32 : i32 to vector<2x128xi32>
    %74 = arith.cmpi sge, %54, %73 : vector<2x128xi32>
    %c96_i32 = arith.constant 96 : i32
    %75 = vector.broadcast %c96_i32 : i32 to vector<2x128xi32>
    %76 = arith.cmpi slt, %54, %75 : vector<2x128xi32>
    %77 = arith.andi %74, %76 : vector<2x128xi1>
    %c0_33 = arith.constant 0 : index
    %c0_34 = arith.constant 0 : index
    %78 = vector.load %arg5[%c0_33, %c0_34] : memref<32x128xbf16, #tpu.memory_space<vmem>>, vector<32x128xbf16>
    %cst_35 = arith.constant 0.000000e+00 : f32
    %79 = vector.broadcast %cst_35 : f32 to vector<2x32xf32>
    %cst_36 = arith.constant 0.000000e+00 : f32
    %80 = vector.broadcast %cst_36 : f32 to vector<2x32xf32>
    %cst_37 = arith.constant 0.000000e+00 : f32
    %81 = vector.broadcast %cst_37 : f32 to vector<2x32xf32>
    %82 = vector.extract_strided_slice %53 {offsets = [0, 0, 0], sizes = [2, 1, 128], strides = [1, 1, 1]} : vector<2x8x128xf32> to vector<2x1x128xf32>
    %83 = vector.shape_cast %82 : vector<2x1x128xf32> to vector<2x128xf32>
    %84 = vector.extract_strided_slice %53 {offsets = [0, 7, 0], sizes = [2, 1, 128], strides = [1, 1, 1]} : vector<2x8x128xf32> to vector<2x1x128xf32>
    %85 = vector.shape_cast %84 : vector<2x1x128xf32> to vector<2x128xf32>
    %86 = arith.select %72, %83, %85 : vector<2x128xi1>, vector<2x128xf32>
    %87 = arith.truncf %79 : vector<2x32xf32> to vector<2x32xbf16>
    %cst_38 = arith.constant dense<0.000000e+00> : vector<2x128xf32>
    %88 = tpu.matmul %87, %78, %cst_38 {dimension_numbers = #tpu.dot_dimension_numbers<[1], [0], [0], [1], [0, 0, 1, 1], [], []>} : vector<2x32xbf16>, vector<32x128xbf16>, vector<2x128xf32> -> vector<2x128xf32>
    %89 = arith.addf %86, %88 : vector<2x128xf32>
    %90 = math.tanh %89 : vector<2x128xf32>
    %91 = arith.negf %89 : vector<2x128xf32>
    %92 = math.exp %91 : vector<2x128xf32>
    %cst_39 = arith.constant 1.000000e+00 : f32
    %93 = vector.broadcast %cst_39 : f32 to vector<2x128xf32>
    %94 = arith.addf %93, %92 : vector<2x128xf32>
    %95 = arith.divf %93, %94 : vector<2x128xf32>
    %96 = arith.select %77, %90, %95 : vector<2x128xi1>, vector<2x128xf32>
    %97 = vector.extract_strided_slice %96 {offsets = [0, 0], sizes = [2, 32], strides = [1, 1]} : vector<2x128xf32> to vector<2x32xf32>
    %98 = vector.extract_strided_slice %96 {offsets = [0, 32], sizes = [2, 32], strides = [1, 1]} : vector<2x128xf32> to vector<2x32xf32>
    %99 = vector.extract_strided_slice %96 {offsets = [0, 64], sizes = [2, 32], strides = [1, 1]} : vector<2x128xf32> to vector<2x32xf32>
    %100 = vector.extract_strided_slice %96 {offsets = [0, 96], sizes = [2, 32], strides = [1, 1]} : vector<2x128xf32> to vector<2x32xf32>
    %101 = arith.mulf %98, %80 : vector<2x32xf32>
    %102 = arith.mulf %97, %99 : vector<2x32xf32>
    %103 = arith.addf %101, %102 : vector<2x32xf32>
    %104 = math.tanh %103 : vector<2x32xf32>
    %105 = arith.mulf %100, %104 : vector<2x32xf32>
    %106 = arith.addf %81, %105 : vector<2x32xf32>
    %107 = vector.extract_strided_slice %53 {offsets = [0, 1, 0], sizes = [2, 1, 128], strides = [1, 1, 1]} : vector<2x8x128xf32> to vector<2x1x128xf32>
    %108 = vector.shape_cast %107 : vector<2x1x128xf32> to vector<2x128xf32>
    %109 = vector.extract_strided_slice %53 {offsets = [0, 6, 0], sizes = [2, 1, 128], strides = [1, 1, 1]} : vector<2x8x128xf32> to vector<2x1x128xf32>
    %110 = vector.shape_cast %109 : vector<2x1x128xf32> to vector<2x128xf32>
    %111 = arith.select %72, %108, %110 : vector<2x128xi1>, vector<2x128xf32>
    %112 = arith.truncf %105 : vector<2x32xf32> to vector<2x32xbf16>
    %cst_40 = arith.constant dense<0.000000e+00> : vector<2x128xf32>
    %113 = tpu.matmul %112, %78, %cst_40 {dimension_numbers = #tpu.dot_dimension_numbers<[1], [0], [0], [1], [0, 0, 1, 1], [], []>} : vector<2x32xbf16>, vector<32x128xbf16>, vector<2x128xf32> -> vector<2x128xf32>
    %114 = arith.addf %111, %113 : vector<2x128xf32>
    %115 = math.tanh %114 : vector<2x128xf32>
    %116 = arith.negf %114 : vector<2x128xf32>
    %117 = math.exp %116 : vector<2x128xf32>
    %cst_41 = arith.constant 1.000000e+00 : f32
    %118 = vector.broadcast %cst_41 : f32 to vector<2x128xf32>
    %119 = arith.addf %118, %117 : vector<2x128xf32>
    %120 = arith.divf %118, %119 : vector<2x128xf32>
    %121 = arith.select %77, %115, %120 : vector<2x128xi1>, vector<2x128xf32>
    %122 = vector.extract_strided_slice %121 {offsets = [0, 0], sizes = [2, 32], strides = [1, 1]} : vector<2x128xf32> to vector<2x32xf32>
    %123 = vector.extract_strided_slice %121 {offsets = [0, 32], sizes = [2, 32], strides = [1, 1]} : vector<2x128xf32> to vector<2x32xf32>
    %124 = vector.extract_strided_slice %121 {offsets = [0, 64], sizes = [2, 32], strides = [1, 1]} : vector<2x128xf32> to vector<2x32xf32>
    %125 = vector.extract_strided_slice %121 {offsets = [0, 96], sizes = [2, 32], strides = [1, 1]} : vector<2x128xf32> to vector<2x32xf32>
    %126 = arith.mulf %123, %103 : vector<2x32xf32>
    %127 = arith.mulf %122, %124 : vector<2x32xf32>
    %128 = arith.addf %126, %127 : vector<2x32xf32>
    %129 = math.tanh %128 : vector<2x32xf32>
    %130 = arith.mulf %125, %129 : vector<2x32xf32>
    %131 = arith.addf %106, %130 : vector<2x32xf32>
    %132 = vector.extract_strided_slice %53 {offsets = [0, 2, 0], sizes = [2, 1, 128], strides = [1, 1, 1]} : vector<2x8x128xf32> to vector<2x1x128xf32>
    %133 = vector.shape_cast %132 : vector<2x1x128xf32> to vector<2x128xf32>
    %134 = vector.extract_strided_slice %53 {offsets = [0, 5, 0], sizes = [2, 1, 128], strides = [1, 1, 1]} : vector<2x8x128xf32> to vector<2x1x128xf32>
    %135 = vector.shape_cast %134 : vector<2x1x128xf32> to vector<2x128xf32>
    %136 = arith.select %72, %133, %135 : vector<2x128xi1>, vector<2x128xf32>
    %137 = arith.truncf %130 : vector<2x32xf32> to vector<2x32xbf16>
    %cst_42 = arith.constant dense<0.000000e+00> : vector<2x128xf32>
    %138 = tpu.matmul %137, %78, %cst_42 {dimension_numbers = #tpu.dot_dimension_numbers<[1], [0], [0], [1], [0, 0, 1, 1], [], []>} : vector<2x32xbf16>, vector<32x128xbf16>, vector<2x128xf32> -> vector<2x128xf32>
    %139 = arith.addf %136, %138 : vector<2x128xf32>
    %140 = math.tanh %139 : vector<2x128xf32>
    %141 = arith.negf %139 : vector<2x128xf32>
    %142 = math.exp %141 : vector<2x128xf32>
    %cst_43 = arith.constant 1.000000e+00 : f32
    %143 = vector.broadcast %cst_43 : f32 to vector<2x128xf32>
    %144 = arith.addf %143, %142 : vector<2x128xf32>
    %145 = arith.divf %143, %144 : vector<2x128xf32>
    %146 = arith.select %77, %140, %145 : vector<2x128xi1>, vector<2x128xf32>
    %147 = vector.extract_strided_slice %146 {offsets = [0, 0], sizes = [2, 32], strides = [1, 1]} : vector<2x128xf32> to vector<2x32xf32>
    %148 = vector.extract_strided_slice %146 {offsets = [0, 32], sizes = [2, 32], strides = [1, 1]} : vector<2x128xf32> to vector<2x32xf32>
    %149 = vector.extract_strided_slice %146 {offsets = [0, 64], sizes = [2, 32], strides = [1, 1]} : vector<2x128xf32> to vector<2x32xf32>
    %150 = vector.extract_strided_slice %146 {offsets = [0, 96], sizes = [2, 32], strides = [1, 1]} : vector<2x128xf32> to vector<2x32xf32>
    %151 = arith.mulf %148, %128 : vector<2x32xf32>
    %152 = arith.mulf %147, %149 : vector<2x32xf32>
    %153 = arith.addf %151, %152 : vector<2x32xf32>
    %154 = math.tanh %153 : vector<2x32xf32>
    %155 = arith.mulf %150, %154 : vector<2x32xf32>
    %156 = arith.addf %131, %155 : vector<2x32xf32>
    %157 = vector.extract_strided_slice %53 {offsets = [0, 3, 0], sizes = [2, 1, 128], strides = [1, 1, 1]} : vector<2x8x128xf32> to vector<2x1x128xf32>
    %158 = vector.shape_cast %157 : vector<2x1x128xf32> to vector<2x128xf32>
    %159 = vector.extract_strided_slice %53 {offsets = [0, 4, 0], sizes = [2, 1, 128], strides = [1, 1, 1]} : vector<2x8x128xf32> to vector<2x1x128xf32>
    %160 = vector.shape_cast %159 : vector<2x1x128xf32> to vector<2x128xf32>
    %161 = arith.select %72, %158, %160 : vector<2x128xi1>, vector<2x128xf32>
    %162 = arith.truncf %155 : vector<2x32xf32> to vector<2x32xbf16>
    %cst_44 = arith.constant dense<0.000000e+00> : vector<2x128xf32>
    %163 = tpu.matmul %162, %78, %cst_44 {dimension_numbers = #tpu.dot_dimension_numbers<[1], [0], [0], [1], [0, 0, 1, 1], [], []>} : vector<2x32xbf16>, vector<32x128xbf16>, vector<2x128xf32> -> vector<2x128xf32>
    %164 = arith.addf %161, %163 : vector<2x128xf32>
    %165 = math.tanh %164 : vector<2x128xf32>
    %166 = arith.negf %164 : vector<2x128xf32>
    %167 = math.exp %166 : vector<2x128xf32>
    %cst_45 = arith.constant 1.000000e+00 : f32
    %168 = vector.broadcast %cst_45 : f32 to vector<2x128xf32>
    %169 = arith.addf %168, %167 : vector<2x128xf32>
    %170 = arith.divf %168, %169 : vector<2x128xf32>
    %171 = arith.select %77, %165, %170 : vector<2x128xi1>, vector<2x128xf32>
    %172 = vector.extract_strided_slice %171 {offsets = [0, 0], sizes = [2, 32], strides = [1, 1]} : vector<2x128xf32> to vector<2x32xf32>
    %173 = vector.extract_strided_slice %171 {offsets = [0, 32], sizes = [2, 32], strides = [1, 1]} : vector<2x128xf32> to vector<2x32xf32>
    %174 = vector.extract_strided_slice %171 {offsets = [0, 64], sizes = [2, 32], strides = [1, 1]} : vector<2x128xf32> to vector<2x32xf32>
    %175 = vector.extract_strided_slice %171 {offsets = [0, 96], sizes = [2, 32], strides = [1, 1]} : vector<2x128xf32> to vector<2x32xf32>
    %176 = arith.mulf %173, %153 : vector<2x32xf32>
    %177 = arith.mulf %172, %174 : vector<2x32xf32>
    %178 = arith.addf %176, %177 : vector<2x32xf32>
    %179 = math.tanh %178 : vector<2x32xf32>
    %180 = arith.mulf %175, %179 : vector<2x32xf32>
    %181 = arith.addf %156, %180 : vector<2x32xf32>
    %182 = vector.extract_strided_slice %53 {offsets = [0, 4, 0], sizes = [2, 1, 128], strides = [1, 1, 1]} : vector<2x8x128xf32> to vector<2x1x128xf32>
    %183 = vector.shape_cast %182 : vector<2x1x128xf32> to vector<2x128xf32>
    %184 = vector.extract_strided_slice %53 {offsets = [0, 3, 0], sizes = [2, 1, 128], strides = [1, 1, 1]} : vector<2x8x128xf32> to vector<2x1x128xf32>
    %185 = vector.shape_cast %184 : vector<2x1x128xf32> to vector<2x128xf32>
    %186 = arith.select %72, %183, %185 : vector<2x128xi1>, vector<2x128xf32>
    %187 = arith.truncf %180 : vector<2x32xf32> to vector<2x32xbf16>
    %cst_46 = arith.constant dense<0.000000e+00> : vector<2x128xf32>
    %188 = tpu.matmul %187, %78, %cst_46 {dimension_numbers = #tpu.dot_dimension_numbers<[1], [0], [0], [1], [0, 0, 1, 1], [], []>} : vector<2x32xbf16>, vector<32x128xbf16>, vector<2x128xf32> -> vector<2x128xf32>
    %189 = arith.addf %186, %188 : vector<2x128xf32>
    %190 = math.tanh %189 : vector<2x128xf32>
    %191 = arith.negf %189 : vector<2x128xf32>
    %192 = math.exp %191 : vector<2x128xf32>
    %cst_47 = arith.constant 1.000000e+00 : f32
    %193 = vector.broadcast %cst_47 : f32 to vector<2x128xf32>
    %194 = arith.addf %193, %192 : vector<2x128xf32>
    %195 = arith.divf %193, %194 : vector<2x128xf32>
    %196 = arith.select %77, %190, %195 : vector<2x128xi1>, vector<2x128xf32>
    %197 = vector.extract_strided_slice %196 {offsets = [0, 0], sizes = [2, 32], strides = [1, 1]} : vector<2x128xf32> to vector<2x32xf32>
    %198 = vector.extract_strided_slice %196 {offsets = [0, 32], sizes = [2, 32], strides = [1, 1]} : vector<2x128xf32> to vector<2x32xf32>
    %199 = vector.extract_strided_slice %196 {offsets = [0, 64], sizes = [2, 32], strides = [1, 1]} : vector<2x128xf32> to vector<2x32xf32>
    %200 = vector.extract_strided_slice %196 {offsets = [0, 96], sizes = [2, 32], strides = [1, 1]} : vector<2x128xf32> to vector<2x32xf32>
    %201 = arith.mulf %198, %178 : vector<2x32xf32>
    %202 = arith.mulf %197, %199 : vector<2x32xf32>
    %203 = arith.addf %201, %202 : vector<2x32xf32>
    %204 = math.tanh %203 : vector<2x32xf32>
    %205 = arith.mulf %200, %204 : vector<2x32xf32>
    %206 = arith.addf %181, %205 : vector<2x32xf32>
    %207 = vector.extract_strided_slice %53 {offsets = [0, 5, 0], sizes = [2, 1, 128], strides = [1, 1, 1]} : vector<2x8x128xf32> to vector<2x1x128xf32>
    %208 = vector.shape_cast %207 : vector<2x1x128xf32> to vector<2x128xf32>
    %209 = vector.extract_strided_slice %53 {offsets = [0, 2, 0], sizes = [2, 1, 128], strides = [1, 1, 1]} : vector<2x8x128xf32> to vector<2x1x128xf32>
    %210 = vector.shape_cast %209 : vector<2x1x128xf32> to vector<2x128xf32>
    %211 = arith.select %72, %208, %210 : vector<2x128xi1>, vector<2x128xf32>
    %212 = arith.truncf %205 : vector<2x32xf32> to vector<2x32xbf16>
    %cst_48 = arith.constant dense<0.000000e+00> : vector<2x128xf32>
    %213 = tpu.matmul %212, %78, %cst_48 {dimension_numbers = #tpu.dot_dimension_numbers<[1], [0], [0], [1], [0, 0, 1, 1], [], []>} : vector<2x32xbf16>, vector<32x128xbf16>, vector<2x128xf32> -> vector<2x128xf32>
    %214 = arith.addf %211, %213 : vector<2x128xf32>
    %215 = math.tanh %214 : vector<2x128xf32>
    %216 = arith.negf %214 : vector<2x128xf32>
    %217 = math.exp %216 : vector<2x128xf32>
    %cst_49 = arith.constant 1.000000e+00 : f32
    %218 = vector.broadcast %cst_49 : f32 to vector<2x128xf32>
    %219 = arith.addf %218, %217 : vector<2x128xf32>
    %220 = arith.divf %218, %219 : vector<2x128xf32>
    %221 = arith.select %77, %215, %220 : vector<2x128xi1>, vector<2x128xf32>
    %222 = vector.extract_strided_slice %221 {offsets = [0, 0], sizes = [2, 32], strides = [1, 1]} : vector<2x128xf32> to vector<2x32xf32>
    %223 = vector.extract_strided_slice %221 {offsets = [0, 32], sizes = [2, 32], strides = [1, 1]} : vector<2x128xf32> to vector<2x32xf32>
    %224 = vector.extract_strided_slice %221 {offsets = [0, 64], sizes = [2, 32], strides = [1, 1]} : vector<2x128xf32> to vector<2x32xf32>
    %225 = vector.extract_strided_slice %221 {offsets = [0, 96], sizes = [2, 32], strides = [1, 1]} : vector<2x128xf32> to vector<2x32xf32>
    %226 = arith.mulf %223, %203 : vector<2x32xf32>
    %227 = arith.mulf %222, %224 : vector<2x32xf32>
    %228 = arith.addf %226, %227 : vector<2x32xf32>
    %229 = math.tanh %228 : vector<2x32xf32>
    %230 = arith.mulf %225, %229 : vector<2x32xf32>
    %231 = arith.addf %206, %230 : vector<2x32xf32>
    %232 = vector.extract_strided_slice %53 {offsets = [0, 6, 0], sizes = [2, 1, 128], strides = [1, 1, 1]} : vector<2x8x128xf32> to vector<2x1x128xf32>
    %233 = vector.shape_cast %232 : vector<2x1x128xf32> to vector<2x128xf32>
    %234 = vector.extract_strided_slice %53 {offsets = [0, 1, 0], sizes = [2, 1, 128], strides = [1, 1, 1]} : vector<2x8x128xf32> to vector<2x1x128xf32>
    %235 = vector.shape_cast %234 : vector<2x1x128xf32> to vector<2x128xf32>
    %236 = arith.select %72, %233, %235 : vector<2x128xi1>, vector<2x128xf32>
    %237 = arith.truncf %230 : vector<2x32xf32> to vector<2x32xbf16>
    %cst_50 = arith.constant dense<0.000000e+00> : vector<2x128xf32>
    %238 = tpu.matmul %237, %78, %cst_50 {dimension_numbers = #tpu.dot_dimension_numbers<[1], [0], [0], [1], [0, 0, 1, 1], [], []>} : vector<2x32xbf16>, vector<32x128xbf16>, vector<2x128xf32> -> vector<2x128xf32>
    %239 = arith.addf %236, %238 : vector<2x128xf32>
    %240 = math.tanh %239 : vector<2x128xf32>
    %241 = arith.negf %239 : vector<2x128xf32>
    %242 = math.exp %241 : vector<2x128xf32>
    %cst_51 = arith.constant 1.000000e+00 : f32
    %243 = vector.broadcast %cst_51 : f32 to vector<2x128xf32>
    %244 = arith.addf %243, %242 : vector<2x128xf32>
    %245 = arith.divf %243, %244 : vector<2x128xf32>
    %246 = arith.select %77, %240, %245 : vector<2x128xi1>, vector<2x128xf32>
    %247 = vector.extract_strided_slice %246 {offsets = [0, 0], sizes = [2, 32], strides = [1, 1]} : vector<2x128xf32> to vector<2x32xf32>
    %248 = vector.extract_strided_slice %246 {offsets = [0, 32], sizes = [2, 32], strides = [1, 1]} : vector<2x128xf32> to vector<2x32xf32>
    %249 = vector.extract_strided_slice %246 {offsets = [0, 64], sizes = [2, 32], strides = [1, 1]} : vector<2x128xf32> to vector<2x32xf32>
    %250 = vector.extract_strided_slice %246 {offsets = [0, 96], sizes = [2, 32], strides = [1, 1]} : vector<2x128xf32> to vector<2x32xf32>
    %251 = arith.mulf %248, %228 : vector<2x32xf32>
    %252 = arith.mulf %247, %249 : vector<2x32xf32>
    %253 = arith.addf %251, %252 : vector<2x32xf32>
    %254 = math.tanh %253 : vector<2x32xf32>
    %255 = arith.mulf %250, %254 : vector<2x32xf32>
    %256 = arith.addf %231, %255 : vector<2x32xf32>
    %257 = vector.extract_strided_slice %53 {offsets = [0, 7, 0], sizes = [2, 1, 128], strides = [1, 1, 1]} : vector<2x8x128xf32> to vector<2x1x128xf32>
    %258 = vector.shape_cast %257 : vector<2x1x128xf32> to vector<2x128xf32>
    %259 = vector.extract_strided_slice %53 {offsets = [0, 0, 0], sizes = [2, 1, 128], strides = [1, 1, 1]} : vector<2x8x128xf32> to vector<2x1x128xf32>
    %260 = vector.shape_cast %259 : vector<2x1x128xf32> to vector<2x128xf32>
    %261 = arith.select %72, %258, %260 : vector<2x128xi1>, vector<2x128xf32>
    %262 = arith.truncf %255 : vector<2x32xf32> to vector<2x32xbf16>
    %cst_52 = arith.constant dense<0.000000e+00> : vector<2x128xf32>
    %263 = tpu.matmul %262, %78, %cst_52 {dimension_numbers = #tpu.dot_dimension_numbers<[1], [0], [0], [1], [0, 0, 1, 1], [], []>} : vector<2x32xbf16>, vector<32x128xbf16>, vector<2x128xf32> -> vector<2x128xf32>
    %264 = arith.addf %261, %263 : vector<2x128xf32>
    %265 = math.tanh %264 : vector<2x128xf32>
    %266 = arith.negf %264 : vector<2x128xf32>
    %267 = math.exp %266 : vector<2x128xf32>
    %cst_53 = arith.constant 1.000000e+00 : f32
    %268 = vector.broadcast %cst_53 : f32 to vector<2x128xf32>
    %269 = arith.addf %268, %267 : vector<2x128xf32>
    %270 = arith.divf %268, %269 : vector<2x128xf32>
    %271 = arith.select %77, %265, %270 : vector<2x128xi1>, vector<2x128xf32>
    %272 = vector.extract_strided_slice %271 {offsets = [0, 0], sizes = [2, 32], strides = [1, 1]} : vector<2x128xf32> to vector<2x32xf32>
    %273 = vector.extract_strided_slice %271 {offsets = [0, 32], sizes = [2, 32], strides = [1, 1]} : vector<2x128xf32> to vector<2x32xf32>
    %274 = vector.extract_strided_slice %271 {offsets = [0, 64], sizes = [2, 32], strides = [1, 1]} : vector<2x128xf32> to vector<2x32xf32>
    %275 = vector.extract_strided_slice %271 {offsets = [0, 96], sizes = [2, 32], strides = [1, 1]} : vector<2x128xf32> to vector<2x32xf32>
    %276 = arith.mulf %273, %253 : vector<2x32xf32>
    %277 = arith.mulf %272, %274 : vector<2x32xf32>
    %278 = arith.addf %276, %277 : vector<2x32xf32>
    %279 = math.tanh %278 : vector<2x32xf32>
    %280 = arith.mulf %275, %279 : vector<2x32xf32>
    %281 = arith.addf %256, %280 : vector<2x32xf32>
    %282 = tpu.concatenate %46, %281 in 1 : vector<2x64xf32>, vector<2x32xf32> -> vector<2x96xf32>
    %c0_54 = arith.constant 0 : index
    %c0_55 = arith.constant 0 : index
    %283 = vector.load %arg7[%c0_54, %c0_55] : memref<2x96xf32, #tpu.memory_space<vmem>>, vector<2x96xf32>
    tpu.vector_store %arg7[%c0_54, %c0_55], %282 {strides = array<i32>} : memref<2x96xf32, #tpu.memory_space<vmem>>, vector<2x96xf32>,
    return
  }
}

</mosaic_0001>

<bundles_post_ra>
// kernel: tpu_custom_call.1
= control target key start
LH: loop header
LB: loop body
LE: loop exit
PB: predicated region body
PF: predicated region fallthrough
CT: control target
= control target key end

     0   :  { %v2145_v1 = vmov 0.0   ;;  %vm2146_vm0 = vmmov 0   ;;  %vm44_vm1 = vcmask 259072   ;;  %s2645_s0 = inlined_call_operand.vmem [shape: f32[2,8,6,32], index: 0, kind: input, shape index: {}]   ;;  %s2646_s1 = inlined_call_operand.vmem [shape: bf16[32,64], index: 1, kind: input, shape index: {}]   ;;  %s2647_s2 = inlined_call_operand.vmem [shape: bf16[4,32,64], index: 2, kind: input, shape index: {}]   ;;  %s2648_s3 = inlined_call_operand.vmem [shape: f32[1,64], index: 3, kind: input, shape index: {}]   ;;  %s2649_s4 = inlined_call_operand.vmem [shape: bf16[32,128], index: 4, kind: input, shape index: {}]   ;;  %s2650_s5 = inlined_call_operand.vmem [shape: bf16[32,128], index: 5, kind: input, shape index: {}]   ;;  %s2651_s6 = inlined_call_operand.vmem [shape: f32[1,128], index: 6, kind: input, shape index: {}]   ;;  %s2652_s7 = inlined_call_operand.hbm [shape: f32[2,96], index: 7, kind: output, shape index: {}]  }
   0x1   :  { %v2043_v0 = vld [vmem:[%s2646_s1] sm:$0xff]   ;;  %1923 = vmatprep.subr.bf16.mxu0 %v2145_v1  ;;  %1931 = vmatprep.subr.bf16.mxu1 %v2145_v1  ;;  %v2044_v2 = vld [vmem:[%s2646_s1 + $0x8] sm:$0xff]   ;;  %v30_v5 = vld [vmem:[%s2645_s0 + $0x10] sm:$0x3f] }
   0x2   :  { %1924 = vmatpush3.bf16.msra.mxu0 %v2043_v0  ;;  %1927 = vmatprep.mubr.msk.bf16.mxu0 %vm2146_vm0, %v2145_v1  ;;  %v28_v3 = vld [vmem:[%s2645_s0] sm:$0x3f]  ;;  %v29_v4 = vld [vmem:[%s2645_s0 + $0x8] sm:$0x3f]  ;;  %v31_v6 = vld [vmem:[%s2645_s0 + $0x18] sm:$0x3f] }
   0x3   :  { %1925 = vmatprep.subr.bf16.mxu0 %v2145_v1  ;;  %1935 = vmatprep.mubr.msk.bf16.mxu1 %vm2146_vm0, %v2145_v1  ;;  %v32_v7 = vld [vmem:[%s2645_s0 + $0x20] sm:$0x3f]  ;;  %v33_v8 = vld [vmem:[%s2645_s0 + $0x28] sm:$0x3f]  ;;  %v34_v9 = vld [vmem:[%s2645_s0 + $0x30] sm:$0x3f] }
   0x4   :  { %v35_v10 = vld [vmem:[%s2645_s0 + $0x38] sm:$0x3f]  ;;  %v45_v11 = vsel %vm44_vm1, %v28_v3, 0.0  ;;  %v52_v12 = vsel %vm44_vm1, %v29_v4, 0.0  ;;  %v59_v13 = vsel %vm44_vm1, %v30_v5, 0.0  ;;  %v66_v14 = vsel %vm44_vm1, %v31_v6, 0.0 }
   0x5   :  { %v46_v15 = vrot.slane %v45_v11, 4  ;;  %v53_v16 = vrot.slane %v52_v12, 4  ;;  %v60_v17 = vrot.slane %v59_v13, 4  ;;  %v67_v18 = vrot.slane %v66_v14, 4  ;;  %v36_v43 = vld [vmem:[%s2645_s0 + $0x40] sm:$0x3f] }
   0x6   :  { %1926 = vmatpush3.bf16.msra.mxu0 %v2044_v2  ;;  %v73_v19 = vsel %vm44_vm1, %v32_v7, 0.0  ;;  %v80_v20 = vsel %vm44_vm1, %v33_v8, 0.0  ;;  %v87_v21 = vsel %vm44_vm1, %v34_v9, 0.0  ;;  %v94_v22 = vsel %vm44_vm1, %v35_v10, 0.0  ;;  %v37_v44 = vld [vmem:[%s2645_s0 + $0x48] sm:$0x3f] }
   0x7   :  { %1939 = vmatprep.subr.bf16.mxu0 %v2145_v1  ;;  %v47_v23 = vadd.f32 %v46_v15, %v45_v11  ;;  %v54_v24 = vadd.f32 %v53_v16, %v52_v12  ;;  %v61_v25 = vadd.f32 %v60_v17, %v59_v13  ;;  %v68_v26 = vadd.f32 %v67_v18, %v66_v14  ;;  %v38_v45 = vld [vmem:[%s2645_s0 + $0x50] sm:$0x3f]  ;;  %v39_v46 = vld [vmem:[%s2645_s0 + $0x58] sm:$0x3f]  ;;  %v40_v59 = vld [vmem:[%s2645_s0 + $0x60] sm:$0x3f] }
   0x8   :  { %v74_v27 = vrot.slane %v73_v19, 4  ;;  %v81_v28 = vrot.slane %v80_v20, 4  ;;  %v88_v29 = vrot.slane %v87_v21, 4  ;;  %v95_v30 = vrot.slane %v94_v22, 4  ;;  %v41_v60 = vld [vmem:[%s2645_s0 + $0x68] sm:$0x3f] }
   0x9   :  { %v48_v31 = vrot.slane %v47_v23, 2  ;;  %v55_v32 = vrot.slane %v54_v24, 2  ;;  %v62_v33 = vrot.slane %v61_v25, 2  ;;  %v69_v34 = vrot.slane %v68_v26, 2  ;;  %v42_v61 = vld [vmem:[%s2645_s0 + $0x70] sm:$0x3f] }
   0xa   :  { %v75_v35 = vadd.f32 %v74_v27, %v73_v19  ;;  %v82_v36 = vadd.f32 %v81_v28, %v80_v20  ;;  %v89_v37 = vadd.f32 %v88_v29, %v87_v21  ;;  %v96_v38 = vadd.f32 %v95_v30, %v94_v22  ;;  %v43_v63 = vld [vmem:[%s2645_s0 + $0x78] sm:$0x3f] }
   0xb   :  { %v49_v39 = vadd.f32 %v48_v31, %v47_v23  ;;  %v56_v40 = vadd.f32 %v55_v32, %v54_v24  ;;  %v63_v41 = vadd.f32 %v62_v33, %v61_v25  ;;  %v70_v42 = vadd.f32 %v69_v34, %v68_v26 }
   0xc   :  { %v76_v47 = vrot.slane %v75_v35, 2  ;;  %v83_v48 = vrot.slane %v82_v36, 2  ;;  %v90_v49 = vrot.slane %v89_v37, 2  ;;  %v97_v50 = vrot.slane %v96_v38, 2 }
   0xd   :  { %v50_v51 = vrot.slane %v49_v39, 1  ;;  %v57_v52 = vrot.slane %v56_v40, 1  ;;  %v64_v53 = vrot.slane %v63_v41, 1  ;;  %v71_v54 = vrot.slane %v70_v42, 1 }
   0xe   :  { %v77_v55 = vadd.f32 %v76_v47, %v75_v35  ;;  %v84_v56 = vadd.f32 %v83_v48, %v82_v36  ;;  %v91_v57 = vadd.f32 %v90_v49, %v89_v37  ;;  %v98_v58 = vadd.f32 %v97_v50, %v96_v38 }
   0xf   :  { %v2260_v62 = vadd.f32 %v50_v51, %v49_v39  ;;  %v2265_v0 = vadd.f32 %v57_v52, %v56_v40  ;;  %v2267_v2 = vadd.f32 %v64_v53, %v63_v41  ;;  %v2269_v3 = vadd.f32 %v71_v54, %v70_v42 }
  0x10   :  { %v78_v4 = vrot.slane %v77_v55, 1  ;;  %v101_v5 = vsel %vm44_vm1, %v36_v43, 0.0  ;;  %v108_v6 = vsel %vm44_vm1, %v37_v44, 0.0  ;;  %v115_v7 = vsel %vm44_vm1, %v38_v45, 0.0 }
  0x11   :  { %v122_v8 = vsel %vm44_vm1, %v39_v46, 0.0  ;;  %v85_v10 = vrot.slane %v84_v56, 1  ;;  %v92_v11 = vrot.slane %v91_v57, 1  ;;  %v99_v12 = vrot.slane %v98_v58, 1 }
  0x12   :  { %v2275_v9 = vadd.f32 %v78_v4, %v77_v55 }
  0x13   :  { %12 = vsyncpa [#allocation3], 0  ;;  %v102_v13 = vrot.slane %v101_v5, 4  ;;  %v109_v14 = vrot.slane %v108_v6, 4  ;;  %v116_v15 = vrot.slane %v115_v7, 4  ;;  %v123_v16 = vrot.slane %v122_v8, 4 }
  0x14   :  { %v129_v17 = vsel %vm44_vm1, %v40_v59, 0.0  ;;  %v136_v18 = vsel %vm44_vm1, %v41_v60, 0.0  ;;  %v143_v19 = vsel %vm44_vm1, %v42_v61, 0.0  ;;  %v150_v20 = vsel %vm44_vm1, %v43_v63, 0.0  ;;  %s2148_s19 = smov 96   ;;  %s2151_s0 = smov 32  }
  0x15   :  { %v103_v21 = vadd.f32 %v102_v13, %v101_v5  ;;  %v110_v22 = vadd.f32 %v109_v14, %v108_v6  ;;  %v117_v23 = vadd.f32 %v116_v15, %v115_v7  ;;  %v124_v24 = vadd.f32 %v123_v16, %v122_v8  ;;  %s2152_s12 = smov [#allocation2]  }
  0x16   :  { %v130_v25 = vrot.slane %v129_v17, 4  ;;  %v137_v26 = vrot.slane %v136_v18, 4  ;;  %v144_v27 = vrot.slane %v143_v19, 4  ;;  %v151_v28 = vrot.slane %v150_v20, 4  ;;  %s1818_s13 = sshll.u32 %s2152_s12, 4  ;;  %s1819_s13 = int_to_ptr.vmem [resolvable:$true] %s1818_s13 }
  0x17   :  { %v104_v29 = vrot.slane %v103_v21, 2  ;;  %v111_v30 = vrot.slane %v110_v22, 2  ;;  %v118_v31 = vrot.slane %v117_v23, 2  ;;  %v125_v32 = vrot.slane %v124_v24, 2  ;;  %s2121_s14 = scalar_lea.vmem %s1819_s13, 32  ;;  %p2126_p1 = scmp.lt.s32.totalorder %s1819_s13, %s1819_s13 }
  0x18   :  { %v131_v33 = vadd.f32 %v130_v25, %v129_v17  ;;  %v138_v34 = vadd.f32 %v137_v26, %v136_v18  ;;  %v145_v35 = vadd.f32 %v144_v27, %v143_v19  ;;  %v152_v36 = vadd.f32 %v151_v28, %v150_v20  ;;  %p2122_p0 = scmp.ne.s32.totalorder %s1819_s13, %s2121_s14  ;;  %p2127_p2 = scmp.lt.s32.totalorder %s2121_s14, %s2121_s14 }
  0x19   :  { %v105_v37 = vadd.f32 %v104_v29, %v103_v21  ;;  %v112_v38 = vadd.f32 %v111_v30, %v110_v22  ;;  %v119_v39 = vadd.f32 %v118_v31, %v117_v23  ;;  %v126_v40 = vadd.f32 %v125_v32, %v124_v24 }
  0x1a   :  { %v132_v41 = vrot.slane %v131_v33, 2  ;;  %v139_v42 = vrot.slane %v138_v34, 2  ;;  %v146_v43 = vrot.slane %v145_v35, 2  ;;  %v153_v44 = vrot.slane %v152_v36, 2  ;;  %p2128_p3 = por %p2127_p2, %p2126_p1 }
  0x1b   :  { %v106_v45 = vrot.slane %v105_v37, 1  ;;  %v113_v46 = vrot.slane %v112_v38, 1  ;;  %v120_v47 = vrot.slane %v119_v39, 1  ;;  %v127_v48 = vrot.slane %v126_v40, 1 }
  0x1c   :  { %v133_v49 = vadd.f32 %v132_v41, %v131_v33  ;;  %v140_v50 = vadd.f32 %v139_v42, %v138_v34  ;;  %v147_v51 = vadd.f32 %v146_v43, %v145_v35  ;;  %v154_v52 = vadd.f32 %v153_v44, %v152_v36  ;;  %p2129_p4 = pnand %p2128_p3, %p2122_p0 }
  0x1d   :  { %v86_v53 = vadd.f32 %v85_v10, %v84_v56  ;;  %v93_v54 = vadd.f32 %v92_v11, %v91_v57  ;;  %v100_v55 = vadd.f32 %v99_v12, %v98_v58  ;;  %v107_v59 = vadd.f32 %v106_v45, %v105_v37 }
  0x1e   :  { %v134_v60 = vrot.slane %v133_v49, 1  ;;  %v141_v61 = vrot.slane %v140_v50, 1  ;;  %v148_v63 = vrot.slane %v147_v51, 1  ;;  %v155_v4 = vrot.slane %v154_v52, 1 }
  0x1f   :  { %v114_v5 = vadd.f32 %v113_v46, %v112_v38  ;;  %v121_v6 = vadd.f32 %v120_v47, %v119_v39  ;;  %v128_v7 = vadd.f32 %v127_v48, %v126_v40  ;;  %v158_v8 = vmul.f32 0.16666667, %v2260_v62 }
  0x20   :  { %v135_v13 = vadd.f32 %v134_v60, %v133_v49  ;;  %v142_v14 = vadd.f32 %v141_v61, %v140_v50  ;;  %v159_v15 = vmul.f32 0.16666667, %v2265_v0  ;;  %v160_v16 = vmul.f32 0.16666667, %v2267_v2 }
  0x21   :  { %v149_v17 = vadd.f32 %v148_v63, %v147_v51  ;;  %v156_v56 = vadd.f32 %v155_v4, %v154_v52  ;;  %v161_v57 = vmul.f32 0.16666667, %v2269_v3  ;;  %v162_v58 = vmul.f32 0.16666667, %v2275_v9 }
  0x22   :  { %vm226_vm2 = vcmask 1041409   ;;  %v163_v10 = vmul.f32 0.16666667, %v86_v53  ;;  %v164_v11 = vmul.f32 0.16666667, %v93_v54  ;;  %vm228_vm3 = vcmask 1042434  }
  0x23   :  { %v166_v12 = vmul.f32 0.16666667, %v107_v59  ;;  %v167_v18 = vmul.f32 0.16666667, %v114_v5  ;;  %v168_v19 = vmul.f32 0.16666667, %v121_v6  ;;  %v174_v0 = vpack.c.bf16 %v158_v8, %v158_v8 }
  0x24   :  { %v169_v62 = vmul.f32 0.16666667, %v128_v7  ;;  %vm230_vm4 = vcmask 1043459   ;;  %v165_v20 = vmul.f32 0.16666667, %v100_v55  ;;  %v175_v22 = vpack.c.bf16 %v159_v15, %v159_v15 }
  0x25   :  { %v170_v21 = vmul.f32 0.16666667, %v135_v13  ;;  %v171_v2 = vmul.f32 0.16666667, %v142_v14  ;;  %v172_v23 = vmul.f32 0.16666667, %v149_v17  ;;  %v176_v25 = vpack.c.bf16 %v160_v16, %v160_v16 }
  0x26   :  { %v173_v24 = vmul.f32 0.16666667, %v156_v56  ;;  %v177_v3 = vpack.c.bf16 %v161_v57, %v161_v57  ;;  %v182_v26 = vpack.c.bf16 %v166_v12, %v166_v12  ;;  %v183_v9 = vpack.c.bf16 %v167_v18, %v167_v18  ;;  %v2045_v16 = vld [vmem:[%s2647_s2 + $0x10] sm:$0xff]   ;;  %v2046_v17 = vld [vmem:[%s2647_s2] sm:$0xff]   ;;  %v2047_v56 = vld [vmem:[%s2647_s2 + $0x18] sm:$0xff]  }
  0x27   :  { %v184_v27 = vpack.c.bf16 %v168_v19, %v168_v19  ;;  %v178_v28 = vpack.c.bf16 %v162_v58, %v162_v58  ;;  %v179_v29 = vpack.c.bf16 %v163_v10, %v163_v10  ;;  %v180_v30 = vpack.c.bf16 %v164_v11, %v164_v11  ;;  %1932 = vmatpush3.bf16.msra.mxu1 %v2045_v16  ;;  %v2048_v57 = vld [vmem:[%s2647_s2 + $0x8] sm:$0xff]  }
  0x28   :  { %v185_v31 = vpack.c.bf16 %v169_v62, %v169_v62  ;;  %v181_v32 = vpack.c.bf16 %v165_v20, %v165_v20  ;;  %v186_v33 = vpack.c.bf16 %v170_v21, %v170_v21  ;;  %v210_v34 = vunpack.c.l.b16 %v174_v0  ;;  %1933 = vmatprep.subr.bf16.mxu1 %v2145_v1 }
  0x29   :  { %v211_v35 = vunpack.c.l.b16 %v175_v22  ;;  %v187_v36 = vpack.c.bf16 %v171_v2, %v171_v2  ;;  %v188_v37 = vpack.c.bf16 %v172_v23, %v172_v23  ;;  %v189_v38 = vpack.c.bf16 %v173_v24, %v173_v24 }
  0x2a   :  { %v212_v39 = vunpack.c.l.b16 %v176_v25  ;;  %v213_v40 = vunpack.c.l.b16 %v177_v3  ;;  %v218_v41 = vunpack.c.l.b16 %v182_v26  ;;  %v219_v42 = vunpack.c.l.b16 %v183_v9 }
  0x2b   :  { %v220_v43 = vunpack.c.l.b16 %v184_v27  ;;  %v214_v44 = vunpack.c.l.b16 %v178_v28  ;;  %v215_v45 = vunpack.c.l.b16 %v179_v29  ;;  %v216_v46 = vunpack.c.l.b16 %v180_v30  ;;  %1934 = vmatpush3.bf16.msra.mxu1 %v2047_v56 }
  0x2c   :  { %v221_v47 = vunpack.c.l.b16 %v185_v31  ;;  %v217_v48 = vunpack.c.l.b16 %v181_v32  ;;  %v222_v49 = vunpack.c.l.b16 %v186_v33  ;;  %v227_v50 = vsel %vm226_vm2, %v211_v35, %v210_v34  ;;  %1947 = vmatprep.subr.bf16.mxu1 %v2145_v1 }
  0x2d   :  { %vm232_vm5 = vcmask 1044484   ;;  %v223_v51 = vunpack.c.l.b16 %v187_v36  ;;  %v229_v52 = vsel %vm228_vm3, %v212_v39, %v227_v50  ;;  %vm234_vm6 = vcmask 1045509  }
  0x2e   :  { %v240_v53 = vsel %vm226_vm2, %v219_v42, %v218_v41  ;;  %v224_v54 = vunpack.c.l.b16 %v188_v37  ;;  %v231_v55 = vsel %vm230_vm4, %v213_v40, %v229_v52  ;;  %vm236_vm7 = vcmask 1046534  }
  0x2f   :  { %v241_v59 = vsel %vm228_vm3, %v220_v43, %v240_v53  ;;  %v225_v60 = vunpack.c.l.b16 %v189_v38  ;;  %v233_v61 = vsel %vm232_vm5, %v214_v44, %v231_v55  ;;  %vm238_vm8 = vcmask 1047559  }
  0x30   :  { %v242_v63 = vsel %vm230_vm4, %v221_v47, %v241_v59  ;;  %v235_v4 = vsel %vm234_vm6, %v215_v45, %v233_v61  ;;  %vm260_vm9 = vcmask 261120   ;;  %v2147_v58 = vmov 1966171168  }
  0x31   :  { %v243_v5 = vsel %vm232_vm5, %v222_v49, %v242_v63  ;;  %v237_v6 = vsel %vm236_vm7, %v216_v46, %v235_v4  ;;  %v309_v10 = vunpack.c.l.s4 %v2147_v58  ;;  %v311_v11 = vlaneseq }
  0x32   :  { %v244_v7 = vsel %vm234_vm6, %v223_v51, %v243_v5  ;;  %v239_v8 = vsel %vm238_vm8, %v217_v48, %v237_v6  ;;  %vm1052_vm10 = vcmask 520192   ;;  %vm1808_vm15 = vcmask 523264  }
  0x33   :  { %v245_v13 = vsel %vm236_vm7, %v224_v54, %v244_v7  ;;  %v310_v12 = vunpack.c.0.s8 %v309_v10  ;;  %v312_v18 = vshrl.u32 %v311_v11, 7 }
  0x34   :  { %v246_v14 = vsel %vm238_vm8, %v225_v60, %v245_v13 }
  0x35   :  { %v247_v15 = vpack.c.b16 %v246_v14, %v239_v8  ;;  %v2312_v19 = vsub.s32 %v310_v12, %v312_v18 }
  0x37   :  { %1928 = vmatmul.mubr.msk.bf16.vlgmr.msra.gmra.mrb[0].mxu0 %vm260_vm9, %v247_v15 }
  0x38   :  { %1943 = vmatprep.mubr.msk.bf16.mxu0 %vm2146_vm0, %v2145_v1  ;;  %1940 = vmatpush3.bf16.msra.mxu0 %v2046_v17 }
  0x39   :  { %1941 = vmatprep.subr.bf16.mxu0 %v2145_v1 }
  0x3c   :  { %1942 = vmatpush3.bf16.msra.mxu0 %v2048_v57 }
  0x3d   :  { %1955 = vmatprep.subr.bf16.mxu0 %v2145_v1 }
 0x10a   :  { %v298_v62 = vpop.f32.mrb[0].mxu0 }
 0x10b   :  { %v307_v20 = vcombine.high %v298_v62, %v298_v62  ;;  %v314_v21 = vrot.slane %v298_v62, %v2312_v19  ;;  %v1929_v0 = vpop.f32.mrb[1].mxu0 }
 0x10c   :  { %v301_v22 = vpop.f32.mrb[2].mxu0 }
 0x10d   :  { %v321_v2 = vrot.slane %v307_v20, %v2312_v19  ;;  %v322_v23 = vcombine.high %v314_v21, %v314_v21  ;;  %v329_v24 = vrot.slane %v314_v21, %v2312_v19  ;;  %v346_v25 = vcombine.high %v301_v22, %v301_v22  ;;  %v1930_v3 = vpop.f32.mrb[3].mxu0 }
 0x10e   :  { %v353_v26 = vrot.slane %v301_v22, %v2312_v19  ;;  %v1067_v9 = vpack.c.bf16 %v301_v22, %v298_v62 }
 0x10f   :  { %v336_v27 = vrot.slane %v321_v2, %v2312_v19  ;;  %v343_v28 = vrot.slane %v322_v23, %v2312_v19  ;;  %v344_v29 = vcombine.high %v329_v24, %v329_v24  ;;  %v456_v30 = vcombine.high %v321_v2, %v321_v2 }
 0x110   :  { %v360_v31 = vrot.slane %v346_v25, %v2312_v19  ;;  %v361_v32 = vcombine.high %v353_v26, %v353_v26  ;;  %v368_v33 = vrot.slane %v353_v26, %v2312_v19  ;;  %1080 = vrot.lane.b32.xlu0 %v1067_v9, %s2148_s19 }
 0x111   :  { %v345_v34 = vcombine.high %v343_v28, %v343_v28  ;;  %v385_v35 = vcombine.low %v329_v24, %v343_v28  ;;  %v1829_v36 = vcombine.high %v329_v24, %v343_v28  ;;  %v463_v37 = vrot.slane %v456_v30, %v2312_v19 }
 0x112   :  { %v472_v38 = vcombine.low %v343_v28, %v344_v29  ;;  %v656_v39 = vcombine.high %v336_v27, %v336_v27  ;;  %v375_v40 = vrot.slane %v360_v31, %v2312_v19  ;;  %v382_v41 = vrot.slane %v361_v32, %v2312_v19 }
 0x113   :  { %v395_v42 = vrot.slane %v385_v35, %v2312_v19  ;;  %v402_v43 = vrot.slane %v1829_v36, %v2312_v19  ;;  %v658_v44 = vcombine.low %v336_v27, %v463_v37  ;;  %v383_v45 = vcombine.high %v368_v33, %v368_v33 }
 0x114   :  { %v482_v46 = vrot.slane %v472_v38, %v2312_v19  ;;  %v774_v47 = vcombine.low %v463_v37, %v656_v39  ;;  %v384_v48 = vcombine.high %v382_v41, %v382_v41  ;;  %v387_v49 = vcombine.low %v336_v27, %v368_v33 }
 0x115   :  { %v417_v50 = vcombine.low %v395_v42, %v402_v43  ;;  %v666_v51 = vrot.slane %v658_v44, %v2312_v19  ;;  %v388_v52 = vcombine.low %v382_v41, %v383_v45  ;;  %v464_v53 = vcombine.high %v360_v31, %v360_v31 }
 0x116   :  { %v409_v54 = vrot.slane %v387_v49, %v2312_v19  ;;  %v434_v55 = vcombine.low %v384_v48, %v375_v40  ;;  %v1830_v59 = vcombine.high %v368_v33, %v382_v41  ;;  %v657_v60 = vcombine.high %v375_v40, %v375_v40  ;;  %v2053_v48 = vld [vmem:[%s2649_s4] sm:$0xff]   ;;  %v2390_v49 = vld [vmem:[%s2650_s5 + $0x8] sm:$0xff]  }
 0x117   :  { %v674_v61 = vcombine.low %v402_v43, %v666_v51  ;;  %v416_v63 = vrot.slane %v388_v52, %v2312_v19  ;;  %v471_v4 = vrot.slane %v464_v53, %v2312_v19  ;;  %v1841_v5 = vcombine.high %v336_v27, %v368_v33 }
 0x118   :  { %v473_v6 = vcombine.low %v345_v34, %v336_v27  ;;  %v474_v7 = vcombine.low %v463_v37, %v382_v41  ;;  %v503_v8 = vrot.slane %v1830_v59, %v2312_v19  ;;  %v1849_v13 = vcombine.high %v463_v37, %v382_v41  ;;  %v2050_v27 = vld [vmem:[%s2647_s2 + $0x30] sm:$0xff]   ;;  %v2049_v37 = vld [vmem:[%s2647_s2 + $0x20] sm:$0xff]   ;;  %v2052_v41 = vld [vmem:[%s2647_s2 + $0x38] sm:$0xff]  }
 0x119   :  { %v418_v14 = vcombine.low %v409_v54, %v416_v63  ;;  %v673_v15 = vrot.slane %v1841_v5, %v2312_v19  ;;  %v691_v16 = vcombine.low %v471_v4, %v657_v60  ;;  %v1850_v17 = vcombine.high %v375_v40, %v471_v4 }
 0x11a   :  { %v489_v56 = vrot.slane %v473_v6, %v2312_v19  ;;  %v496_v57 = vrot.slane %v474_v7, %v2312_v19  ;;  %v521_v58 = vcombine.low %v375_v40, %v471_v4  ;;  %v782_v10 = vrot.slane %v774_v47, %v2312_v19  ;;  %v2378_v47 = vld [vmem:[%s2650_s5] sm:$0xff]  }
 0x11b   :  { %v789_v12 = vrot.slane %v1849_v13, %v2312_v19  ;;  %v425_v18 = vrot.slane %v417_v50, %v2312_v19  ;;  %v432_v62 = vrot.slane %v418_v14, %v2312_v19  ;;  %v441_v20 = vrot.slane %v434_v55, %v2312_v19  ;;  %v2054_v50 = vld [vmem:[%s2649_s4 + $0x8] sm:$0xff]  }
 0x11c   :  { %v504_v21 = vcombine.low %v482_v46, %v489_v56  ;;  %v505_v0 = vcombine.low %v496_v57, %v503_v8  ;;  %v528_v22 = vrot.slane %v521_v58, %v2312_v19  ;;  %v790_v2 = vcombine.low %v489_v56, %v782_v10  ;;  %v2051_v46 = vld [vmem:[%s2647_s2 + $0x28] sm:$0xff]   ;;  %v1858_v56 = vld [vmem:[%s2648_s3] ss:$0 sm:$0xff] }
 0x11d   :  { %v433_v23 = vcombine.low %v425_v18, %v432_v62  ;;  %v448_v24 = vrot.slane %v441_v20, %v2312_v19  ;;  %v675_v25 = vcombine.low %v673_v15, %v441_v20  ;;  %v682_v28 = vrot.slane %v674_v61, %v2312_v19 }
 0x11e   :  { %v512_v3 = vrot.slane %v504_v21, %v2312_v19  ;;  %v519_v26 = vrot.slane %v505_v0, %v2312_v19  ;;  %v791_v9 = vcombine.low %v789_v12, %v528_v22  ;;  %v535_v29 = vrot.slane %v528_v22, %v2312_v19 }
 0x11f   :  { %v451_v30 = vpack.c.bf16 %v448_v24, %v433_v23  ;;  %v689_v31 = vrot.slane %v675_v25, %v2312_v19  ;;  %v698_v32 = vrot.slane %v691_v16, %v2312_v19  ;;  %v798_v35 = vrot.slane %v790_v2, %v2312_v19 }
 0x120   :  { %v520_v33 = vcombine.low %v512_v3, %v519_v26  ;;  %v805_v34 = vrot.slane %v791_v9, %v2312_v19  ;;  %v814_v36 = vrot.slane %v1850_v17, %v2312_v19  ;;  %v2149_v51 = vmov 0  }
 0x121   :  { %1944 = vmatmul.mubr.msk.bf16.vlgmr.msra.gmra.mrb[4].mxu0 %vm260_vm9, %v451_v30  ;;  %v690_v38 = vcombine.low %v682_v28, %v689_v31  ;;  %v705_v39 = vrot.slane %v698_v32, %v2312_v19 }
 0x122   :  { %v538_v40 = vpack.c.bf16 %v535_v29, %v520_v33  ;;  %1956 = vmatpush3.bf16.msra.mxu0 %v2050_v27  ;;  %1959 = vmatprep.mubr.msk.bf16.mxu0 %vm2146_vm0, %v2145_v1  ;;  %v806_v42 = vcombine.low %v798_v35, %v805_v34  ;;  %v821_v43 = vrot.slane %v814_v36, %v2312_v19 }
 0x123   :  { %1957 = vmatprep.subr.bf16.mxu0 %v2145_v1  ;;  %v708_v44 = vpack.c.bf16 %v705_v39, %v690_v38 }
 0x124   :  { %1936 = vmatmul.mubr.msk.bf16.vlgmr.msra.gmra.mrb[0].mxu1 %vm260_vm9, %v538_v40  ;;  %v824_v45 = vpack.c.bf16 %v821_v43, %v806_v42 }
 0x125   :  { %1948 = vmatpush3.bf16.msra.mxu1 %v2049_v37  ;;  %1951 = vmatprep.mubr.msk.bf16.mxu1 %vm2146_vm0, %v2145_v1 }
 0x126   :  { %1949 = vmatprep.subr.bf16.mxu1 %v2145_v1  ;;  %1958 = vmatpush3.bf16.msra.mxu0 %v2052_v41 }
 0x127   :  { %1971 = vmatprep.subr.bf16.mxu0 %v2145_v1 }
 0x129   :  { %1950 = vmatpush3.bf16.msra.mxu1 %v2051_v46  ;;  %1960 = vmatmul.mubr.msk.bf16.vlgmr.msra.gmra.mrb[8].mxu0 %vm260_vm9, %v824_v45 }
 0x12a   :  { %1963 = vmatprep.subr.bf16.mxu1 %v2145_v1  ;;  %1972 = vmatpush3.bf16.msra.mxu0 %v2378_v47 }
 0x12b   :  { %1973 = vmatprep.subr.bf16.mxu0 %v2145_v1  ;;  %1975 = vmatprep.mubr.msk.bf16.mxu0 %vm2146_vm0, %v2145_v1 }
 0x12c   :  { %1952 = vmatmul.mubr.msk.bf16.vlgmr.msra.gmra.mrb[4].mxu1 %vm260_vm9, %v708_v44 }
 0x12d   :  { %1964 = vmatpush3.bf16.msra.mxu1 %v2053_v48  ;;  %1967 = vmatprep.mubr.msk.bf16.mxu1 %vm2146_vm0, %v2145_v1 }
 0x12e   :  { %1965 = vmatprep.subr.bf16.mxu1 %v2145_v1  ;;  %1974 = vmatpush3.bf16.msra.mxu0 %v2390_v49 }
 0x12f   :  { %1987 = vmatprep.subr.bf16.mxu0 %v2145_v1 }
 0x131   :  { %1966 = vmatpush3.bf16.msra.mxu1 %v2054_v50  ;;  %1976 = vmatmul.mubr.bf16.vlgmr.msra.gmra.mrb[12].mxu0 %v2149_v51 }
 0x132   :  { %1979 = vmatprep.subr.bf16.mxu1 %v2145_v1  ;;  %1988 = vmatpush3.bf16.msra.mxu0 %v2378_v47 }
 0x133   :  { %1989 = vmatprep.subr.bf16.mxu0 %v2145_v1  ;;  %1991 = vmatprep.mubr.msk.bf16.mxu0 %vm2146_vm0, %v2145_v1 }
 0x136   :  { %1990 = vmatpush3.bf16.msra.mxu0 %v2390_v49 }
 0x137   :  { %2003 = vmatprep.subr.bf16.mxu0 %v2145_v1 }
 0x182   :  { %v1081_v52 = vpop.permute.xlu0 %1080 }
 0x183   :  { %1968 = vmatmul.mubr.msk.bf16.vlgmr.msra.gmra.mrb[8].mxu1 %vm260_vm9, %v1081_v52 }
 0x184   :  { %1980 = vmatpush3.bf16.msra.mxu1 %v2378_v47  ;;  %1983 = vmatprep.mubr.msk.bf16.mxu1 %vm2146_vm0, %v2145_v1 }
 0x185   :  { %1981 = vmatprep.subr.bf16.mxu1 %v2145_v1 }
 0x188   :  { %1982 = vmatpush3.bf16.msra.mxu1 %v2390_v49 }
 0x189   :  { %1995 = vmatprep.subr.bf16.mxu1 %v2145_v1 }
 0x1f4   :  { %v649_v53 = vpop.f32.mrb[4].mxu0 }
 0x1f5   :  { %v1945_v54 = vpop.f32.mrb[5].mxu0 }
 0x1f6   :  { %v652_v55 = vpop.f32.mrb[6].mxu0 }
 0x1f7   :  { %v593_v59 = vpop.f32.mrb[0].mxu1  ;;  %v1946_v60 = vpop.f32.mrb[7].mxu0 }
 0x1f8   :  { %v650_v61 = vadd.f32 %v649_v53, %v593_v59  ;;  %v1937_v63 = vpop.f32.mrb[1].mxu1 }
 0x1f9   :  { %v596_v4 = vpop.f32.mrb[2].mxu1 }
 0x1fa   :  { %v653_v5 = vadd.f32 %v652_v55, %v596_v4  ;;  %v1938_v6 = vpop.f32.mrb[3].mxu1 }
 0x1fc   :  { %v879_v7 = vpop.f32.mrb[8].mxu0 }
 0x1fd   :  { %v1961_v8 = vpop.f32.mrb[9].mxu0 }
 0x1fe   :  { %v882_v13 = vpop.f32.mrb[10].mxu0 }
 0x1ff   :  { %v763_v14 = vpop.f32.mrb[4].mxu1  ;;  %v1962_v15 = vpop.f32.mrb[11].mxu0 }
 0x200   :  { %v770_v16 = vadd.f32 %v763_v14, %v650_v61  ;;  %v1953_v17 = vpop.f32.mrb[5].mxu1 }
 0x201   :  { %v766_v57 = vpop.f32.mrb[6].mxu1 }
 0x202   :  { %v886_v58 = vadd.f32 %v879_v7, %v770_v16  ;;  %v771_v10 = vadd.f32 %v766_v57, %v653_v5  ;;  %v1954_v12 = vpop.f32.mrb[7].mxu1 }
 0x204   :  { %v895_v18 = vadd.f32 %v1858_v56, %v886_v58  ;;  %v887_v62 = vadd.f32 %v882_v13, %v771_v10  ;;  %v2421_v20 = vpop.f32.mrb[12].mxu0  ;;  %v1860_v10 = vld [vmem:[%s2651_s6] ss:$0 sm:$0xff]  ;;  %s2150_s6 = smov 64  }
 0x205   :  { %v1977_v21 = vpop.f32.mrb[13].mxu0 }
 0x206   :  { %v897_v0 = vmax.f32 %v895_v18, 0.0  ;;  %v896_v22 = vadd.f32 %v1858_v56, %v887_v62  ;;  %v1222_v2 = vpop.f32.mrb[14].mxu0 }
 0x207   :  { %v1978_v23 = vpop.f32.mrb[15].mxu0 }
 0x208   :  { %v901_v24 = vcombine.high %v897_v0, %v897_v0  ;;  %v908_v25 = vrot.slane %v897_v0, %v2312_v19  ;;  %v898_v3 = vmax.f32 %v896_v22, 0.0 }
 0x20a   :  { %v915_v26 = vrot.slane %v901_v24, %v2312_v19  ;;  %v916_v9 = vcombine.high %v908_v25, %v908_v25  ;;  %v956_v27 = vrot.slane %v898_v3, %v2312_v19  ;;  %v924_v28 = vrot.slane %v908_v25, %v2312_v19 }
 0x20c   :  { %v917_v29 = vcombine.high %v915_v26, %v915_v26  ;;  %v931_v30 = vrot.slane %v915_v26, %v2312_v19  ;;  %v938_v31 = vrot.slane %v916_v9, %v2312_v19  ;;  %v957_v32 = vcombine.high %v956_v27, %v956_v27 }
 0x20d   :  { %v964_v38 = vrot.slane %v956_v27, %v2312_v19 }
 0x20e   :  { %v945_v33 = vrot.slane %v917_v29, %v2312_v19  ;;  %v947_v34 = vcombine.high %v931_v30, %v931_v30  ;;  %v972_v35 = vcombine.low %v924_v28, %v938_v31  ;;  %v1859_v36 = vcombine.high %v924_v28, %v938_v31 }
 0x20f   :  { %v994_v37 = vrot.slane %v931_v30, %v2312_v19  ;;  %v971_v39 = vrot.slane %v957_v32, %v2312_v19 }
 0x210   :  { %v980_v40 = vrot.slane %v972_v35, %v2312_v19  ;;  %v987_v41 = vrot.slane %v1859_v36, %v2312_v19  ;;  %v1011_v42 = vcombine.low %v945_v33, %v947_v34  ;;  %v949_v43 = vcombine.high %v945_v33, %v945_v33 }
 0x211   :  { %v1009_v46 = vrot.slane %v994_v37, %v2312_v19  ;;  %v1033_v52 = vrot.slane %v971_v39, %v2312_v19 }
 0x212   :  { %v995_v44 = vcombine.low %v980_v40, %v987_v41  ;;  %v1012_v45 = vcombine.low %v949_v43, %v964_v38  ;;  %v1019_v50 = vrot.slane %v1011_v42, %v2312_v19 }
 0x213   :  { %v1048_v59 = vrot.slane %v1033_v52, %v2312_v19 }
 0x214   :  { %v1002_v48 = vrot.slane %v995_v44, %v2312_v19  ;;  %v1026_v51 = vrot.slane %v1012_v45, %v2312_v19 }
 0x216   :  { %v1010_v53 = vcombine.low %v1002_v48, %v1009_v46  ;;  %v1034_v54 = vcombine.low %v1019_v50, %v1026_v51 }
 0x218   :  { %v1041_v55 = vrot.slane %v1034_v54, %v2312_v19  ;;  %v1053_v60 = vsel %vm1052_vm10, %v1010_v53, -inf  ;;  %v1139_v19 = vand.u32 127, %v311_v11 }
 0x219   :  { %v1054_v61 = vrot.slane %v1053_v60, 4 }
 0x21a   :  { %v1049_v63 = vcombine.low %v1041_v55, %v1048_v59  ;;  %v1144_v12 = vand.u32 31, %v1139_v19  ;;  %vm1153_vm12 = vcmp.ge.s32.totalorder %v1139_v19, 64  ;;  %vm1154_vm13 = vcmp.lt.s32.totalorder %v1139_v19, 96 }
 0x21b   :  { %v1055_v4 = vmax.f32 %v1053_v60, %v1054_v61  ;;  %vm2510_vm14 = vmand %vm1153_vm12, %vm1154_vm13 }
 0x21c   :  { %v1060_v5 = vsel %vm1052_vm10, %v1049_v63, -inf  ;;  %vm2449_vm11 = vcmp.lt.s32.totalorder %v1144_v12, 16 }
 0x21d   :  { %v1056_v6 = vrot.slane %v1055_v4, 2  ;;  %v1061_v7 = vrot.slane %v1060_v5, 4 }
 0x21f   :  { %v1057_v8 = vmax.f32 %v1055_v4, %v1056_v6  ;;  %v1062_v13 = vmax.f32 %v1060_v5, %v1061_v7 }
 0x221   :  { %v1063_v14 = vrot.slane %v1062_v13, 2  ;;  %v1058_v15 = vrot.slane %v1057_v8, 1 }
 0x223   :  { %v1064_v16 = vmax.f32 %v1062_v13, %v1063_v14  ;;  %v1059_v56 = vmax.f32 %v1057_v8, %v1058_v15 }
 0x225   :  { %v1065_v17 = vrot.slane %v1064_v16, 1 }
 0x227   :  { %v1066_v57 = vmax.f32 %v1064_v16, %v1065_v17 }
 0x229   :  { %v2443_v58 = vsel %vm226_vm2, %v1066_v57, %v1059_v56 }
 0x256   :  { %v1131_v18 = vpop.f32.mrb[8].mxu1 }
 0x257   :  { %v1132_v62 = vadd.f32 %v1860_v10, %v1131_v18  ;;  %v1969_v21 = vpop.f32.mrb[9].mxu1 }
 0x258   :  { %v1134_v0 = vpop.f32.mrb[10].mxu1 }
 0x259   :  { %v1135_v22 = vadd.f32 %v1860_v10, %v1134_v0  ;;  %v1970_v2 = vpop.f32.mrb[11].mxu1  ;;  %v1165_v24 = vrot.slane %v1132_v62, 7  ;;  %v1252_v25 = vrot.slane %v1132_v62, 1  ;;  %v1255_v3 = vrot.slane %v1132_v62, 6 }
 0x25a   :  { %v1334_v26 = vrot.slane %v1132_v62, 2  ;;  %v1338_v11 = vrot.slane %v1132_v62, 5  ;;  %v1417_v9 = vrot.slane %v1132_v62, 3  ;;  %v1421_v38 = vrot.slane %v1132_v62, 4 }
 0x25b   :  { %v1162_v27 = vrot.slane %v1135_v22, 7  ;;  %v1166_v28 = vrot.slane %v1135_v22, 6  ;;  %v2454_v29 = vsel %vm226_vm2, %v1135_v22, %v1252_v25  ;;  %v1256_v30 = vrot.slane %v1135_v22, 5 }
 0x25c   :  { %v1335_v31 = vrot.slane %v1135_v22, 1  ;;  %v1339_v32 = vrot.slane %v1135_v22, 4  ;;  %v1418_v33 = vrot.slane %v1135_v22, 2  ;;  %v1422_v34 = vrot.slane %v1135_v22, 3 }
 0x25d   :  { %v2457_v35 = vsel %vm226_vm2, %v1162_v27, %v1132_v62  ;;  %v2460_v36 = vsel %vm226_vm2, %v1166_v28, %v1165_v24  ;;  %v2463_v37 = vsel %vm226_vm2, %v1256_v30, %v1255_v3 }
 0x25e   :  { %v1169_v39 = vsel %vm2449_vm11, %v2457_v35, %v2460_v36  ;;  %v1259_v40 = vsel %vm2449_vm11, %v2454_v29, %v2463_v37  ;;  %v2474_v41 = vsel %vm226_vm2, %v1335_v31, %v1334_v26  ;;  %v2477_v42 = vsel %vm226_vm2, %v1339_v32, %v1338_v11 }
 0x25f   :  { %v1225_v43 = vadd.f32 %v2421_v20, %v1169_v39  ;;  %v1342_v44 = vsel %vm2449_vm11, %v2474_v41, %v2477_v42  ;;  %v2485_v45 = vsel %vm226_vm2, %v1418_v33, %v1417_v9  ;;  %v2488_v46 = vsel %vm226_vm2, %v1422_v34, %v1421_v38 }
 0x260   :  { %v1425_v48 = vsel %vm2449_vm11, %v2485_v45, %v2488_v46  ;;  %v1500_v20 = vsel %vm2449_vm11, %v2488_v46, %v2485_v45  ;;  %v1575_v50 = vsel %vm2449_vm11, %v2477_v42, %v2474_v41  ;;  %v1650_v51 = vsel %vm2449_vm11, %v2463_v37, %v2454_v29 }
 0x261   :  { %v1866_v52 = vmul.f32 -1.442695, %v1225_v43  ;;  %v1725_v53 = vsel %vm2449_vm11, %v2460_v36, %v2457_v35 }
 0x263   :  { %2057 = vpow2.f32 %v1866_v52 }
 0x264   :  { %2059 = vtanh.f32 %v1225_v43 }
 0x26d   :  { %v2058_v54 = vpop.eup %2057 }
 0x26e   :  { %v1230_v55 = vadd.f32 1.0, %v2058_v54  ;;  %v2060_v60 = vpop.eup %2059 }
 0x270   :  { %2061 = vrcp.f32 %v1230_v55 }
 0x27a   :  { %v2062_v61 = vpop.eup %2061 }
 0x27b   :  { %v1233_v63 = vsel %vm2510_vm14, %v2060_v60, %v2062_v61 }
 0x27c   :  { %1236 = vrot.lane.b32.xlu0 %v1233_v63, %s2150_s6  ;;  %v1234_v6 = vmul.f32 0.0, %v1233_v63 }
 0x2ee   :  { %v1237_v4 = vpop.permute.xlu0 %1236 }
 0x2ef   :  { %v1239_v5 = vmul.f32 %v1237_v4, %v1233_v63 }
 0x2f1   :  { %1241 = vrot.lane.b32.xlu1 %v1239_v5, %s2151_s0 }
 0x363   :  { %v1242_v7 = vpop.permute.xlu1 %1241 }
 0x364   :  { %v1244_v8 = vadd.f32 %v1242_v7, %v1234_v6 }
 0x366   :  { %2063 = vtanh.f32 %v1244_v8 }
 0x370   :  { %v2064_v13 = vpop.eup %2063 }
 0x371   :  { %1247 = vrot.lane.b32.xlu1 %v2064_v13, %s2150_s6 }
 0x3e3   :  { %v1248_v14 = vpop.permute.xlu1 %1247 }
 0x3e4   :  { %v2519_v15 = vmul.f32 %v1248_v14, %v1233_v63 }
 0x3e6   :  { %v1260_v16 = vpack.c.bf16 %v2519_v15, %v2519_v15 }
 0x3e8   :  { %1262 = vrot.lane.b32.xlu0 %v1260_v16, %s2151_s0 }
 0x45a   :  { %v1263_v17 = vpop.permute.xlu0 %1262 }
 0x45b   :  { %1984 = vmatmul.mubr.msk.bf16.vlgmr.msra.gmra.mrb[12].mxu1 %vm260_vm9, %v1263_v17 }
 0x45c   :  { %1996 = vmatpush3.bf16.msra.mxu1 %v2378_v47  ;;  %1999 = vmatprep.mubr.msk.bf16.mxu1 %vm2146_vm0, %v2145_v1 }
 0x45d   :  { %1997 = vmatprep.subr.bf16.mxu1 %v2145_v1 }
 0x460   :  { %1998 = vmatpush3.bf16.msra.mxu1 %v2390_v49 }
 0x461   :  { %2011 = vmatprep.subr.bf16.mxu1 %v2145_v1 }
 0x52e   :  { %v1301_v56 = vpop.f32.mrb[12].mxu1 }
 0x52f   :  { %v1307_v57 = vadd.f32 %v1301_v56, %v1259_v40  ;;  %v1985_v19 = vpop.f32.mrb[13].mxu1 }
 0x530   :  { %v1304_v10 = vpop.f32.mrb[14].mxu1 }
 0x531   :  { %v1868_v12 = vmul.f32 -1.442695, %v1307_v57  ;;  %v1986_v18 = vpop.f32.mrb[15].mxu1 }
 0x533   :  { %2065 = vpow2.f32 %v1868_v12 }
 0x534   :  { %2067 = vtanh.f32 %v1307_v57 }
 0x53d   :  { %v2066_v62 = vpop.eup %2065 }
 0x53e   :  { %v1312_v21 = vadd.f32 1.0, %v2066_v62  ;;  %v2068_v0 = vpop.eup %2067 }
 0x540   :  { %2069 = vrcp.f32 %v1312_v21 }
 0x54a   :  { %v2070_v22 = vpop.eup %2069 }
 0x54b   :  { %v1315_v2 = vsel %vm2510_vm14, %v2068_v0, %v2070_v22 }
 0x54c   :  { %1318 = vrot.lane.b32.xlu1 %v1315_v2, %s2150_s6  ;;  %v1316_v3 = vmul.f32 %v1315_v2, %v1244_v8 }
 0x5be   :  { %v1319_v24 = vpop.permute.xlu1 %1318 }
 0x5bf   :  { %v1321_v25 = vmul.f32 %v1319_v24, %v1315_v2 }
 0x5c1   :  { %1323 = vrot.lane.b32.xlu0 %v1321_v25, %s2151_s0 }
 0x633   :  { %v1324_v26 = vpop.permute.xlu0 %1323 }
 0x634   :  { %v1326_v11 = vadd.f32 %v1324_v26, %v1316_v3 }
 0x636   :  { %2071 = vtanh.f32 %v1326_v11 }
 0x640   :  { %v2072_v9 = vpop.eup %2071 }
 0x641   :  { %1329 = vrot.lane.b32.xlu1 %v2072_v9, %s2150_s6 }
 0x6b3   :  { %v1330_v27 = vpop.permute.xlu1 %1329 }
 0x6b4   :  { %v1332_v28 = vmul.f32 %v1330_v27, %v1315_v2 }
 0x6b6   :  { %v1343_v30 = vpack.c.bf16 %v1332_v28, %v1332_v28  ;;  %v1333_v8 = vadd.f32 %v1332_v28, %v2519_v15 }
 0x6b8   :  { %1345 = vrot.lane.b32.xlu0 %v1343_v30, %s2151_s0 }
 0x72a   :  { %v1346_v31 = vpop.permute.xlu0 %1345 }
 0x72b   :  { %1992 = vmatmul.mubr.msk.bf16.vlgmr.msra.gmra.mrb[16].mxu0 %vm260_vm9, %v1346_v31 }
 0x72c   :  { %2004 = vmatpush3.bf16.msra.mxu0 %v2378_v47  ;;  %2007 = vmatprep.mubr.msk.bf16.mxu0 %vm2146_vm0, %v2145_v1 }
 0x72d   :  { %2005 = vmatprep.subr.bf16.mxu0 %v2145_v1 }
 0x730   :  { %2006 = vmatpush3.bf16.msra.mxu0 %v2390_v49 }
 0x731   :  { %2019 = vmatprep.subr.bf16.mxu0 %v2145_v1 }
 0x7fe   :  { %v1384_v32 = vpop.f32.mrb[16].mxu0 }
 0x7ff   :  { %v1390_v33 = vadd.f32 %v1384_v32, %v1342_v44  ;;  %v1993_v34 = vpop.f32.mrb[17].mxu0 }
 0x800   :  { %v1387_v38 = vpop.f32.mrb[18].mxu0 }
 0x801   :  { %v1870_v39 = vmul.f32 -1.442695, %v1390_v33  ;;  %v1994_v40 = vpop.f32.mrb[19].mxu0 }
 0x803   :  { %2073 = vpow2.f32 %v1870_v39 }
 0x804   :  { %2075 = vtanh.f32 %v1390_v33 }
 0x80d   :  { %v2074_v43 = vpop.eup %2073 }
 0x80e   :  { %v1395_v52 = vadd.f32 1.0, %v2074_v43  ;;  %v2076_v54 = vpop.eup %2075 }
 0x810   :  { %2077 = vrcp.f32 %v1395_v52 }
 0x81a   :  { %v2078_v55 = vpop.eup %2077 }
 0x81b   :  { %v1398_v60 = vsel %vm2510_vm14, %v2076_v54, %v2078_v55 }
 0x81c   :  { %1401 = vrot.lane.b32.xlu1 %v1398_v60, %s2150_s6  ;;  %v1399_v44 = vmul.f32 %v1398_v60, %v1326_v11 }
 0x88e   :  { %v1402_v61 = vpop.permute.xlu1 %1401 }
 0x88f   :  { %v1404_v63 = vmul.f32 %v1402_v61, %v1398_v60 }
 0x891   :  { %1406 = vrot.lane.b32.xlu0 %v1404_v63, %s2151_s0 }
 0x903   :  { %v1407_v4 = vpop.permute.xlu0 %1406 }
 0x904   :  { %v1409_v5 = vadd.f32 %v1407_v4, %v1399_v44 }
 0x906   :  { %2079 = vtanh.f32 %v1409_v5 }
 0x910   :  { %v2080_v6 = vpop.eup %2079 }
 0x911   :  { %1412 = vrot.lane.b32.xlu1 %v2080_v6, %s2150_s6 }
 0x983   :  { %v1413_v7 = vpop.permute.xlu1 %1412 }
 0x984   :  { %v1415_v13 = vmul.f32 %v1413_v7, %v1398_v60 }
 0x986   :  { %v1416_v14 = vadd.f32 %v1415_v13, %v1333_v8  ;;  %v1426_v16 = vpack.c.bf16 %v1415_v13, %v1415_v13 }
 0x988   :  { %1428 = vrot.lane.b32.xlu0 %v1426_v16, %s2151_s0 }
 0x9fa   :  { %v1429_v17 = vpop.permute.xlu0 %1428 }
 0x9fb   :  { %2000 = vmatmul.mubr.msk.bf16.vlgmr.msra.gmra.mrb[16].mxu1 %vm260_vm9, %v1429_v17 }
 0x9fc   :  { %2012 = vmatpush3.bf16.msra.mxu1 %v2378_v47  ;;  %2015 = vmatprep.mubr.msk.bf16.mxu1 %vm2146_vm0, %v2145_v1 }
 0x9fd   :  { %2013 = vmatprep.subr.bf16.mxu1 %v2145_v1 }
 0xa00   :  { %2014 = vmatpush3.bf16.msra.mxu1 %v2390_v49 }
 0xa01   :  { %2027 = vmatprep.subr.bf16.mxu1 %v2145_v1 }
 0xace   :  { %v1467_v15 = vpop.f32.mrb[16].mxu1 }
 0xacf   :  { %v1473_v56 = vadd.f32 %v1467_v15, %v1425_v48  ;;  %v2001_v57 = vpop.f32.mrb[17].mxu1 }
 0xad0   :  { %v1470_v19 = vpop.f32.mrb[18].mxu1 }
 0xad1   :  { %v1872_v10 = vmul.f32 -1.442695, %v1473_v56  ;;  %v2002_v12 = vpop.f32.mrb[19].mxu1 }
 0xad3   :  { %2081 = vpow2.f32 %v1872_v10 }
 0xad4   :  { %2083 = vtanh.f32 %v1473_v56 }
 0xadd   :  { %v2082_v18 = vpop.eup %2081 }
 0xade   :  { %v1478_v62 = vadd.f32 1.0, %v2082_v18  ;;  %v2084_v21 = vpop.eup %2083 }
 0xae0   :  { %2085 = vrcp.f32 %v1478_v62 }
 0xaea   :  { %v2086_v0 = vpop.eup %2085 }
 0xaeb   :  { %v1481_v22 = vsel %vm2510_vm14, %v2084_v21, %v2086_v0 }
 0xaec   :  { %1484 = vrot.lane.b32.xlu1 %v1481_v22, %s2150_s6  ;;  %v1482_v48 = vmul.f32 %v1481_v22, %v1409_v5 }
 0xb5e   :  { %v1485_v2 = vpop.permute.xlu1 %1484 }
 0xb5f   :  { %v1487_v24 = vmul.f32 %v1485_v2, %v1481_v22 }
 0xb61   :  { %1489 = vrot.lane.b32.xlu0 %v1487_v24, %s2151_s0 }
 0xbd3   :  { %v1490_v25 = vpop.permute.xlu0 %1489 }
 0xbd4   :  { %v1492_v3 = vadd.f32 %v1490_v25, %v1482_v48 }
 0xbd6   :  { %2087 = vtanh.f32 %v1492_v3 }
 0xbe0   :  { %v2088_v26 = vpop.eup %2087 }
 0xbe1   :  { %1495 = vrot.lane.b32.xlu1 %v2088_v26, %s2150_s6 }
 0xc53   :  { %v1496_v11 = vpop.permute.xlu1 %1495 }
 0xc54   :  { %v1498_v9 = vmul.f32 %v1496_v11, %v1481_v22 }
 0xc56   :  { %v1499_v27 = vadd.f32 %v1498_v9, %v1416_v14  ;;  %v1501_v28 = vpack.c.bf16 %v1498_v9, %v1498_v9 }
 0xc58   :  { %1503 = vrot.lane.b32.xlu0 %v1501_v28, %s2151_s0 }
 0xcca   :  { %v1504_v30 = vpop.permute.xlu0 %1503 }
 0xccb   :  { %2008 = vmatmul.mubr.msk.bf16.vlgmr.msra.gmra.mrb[20].mxu0 %vm260_vm9, %v1504_v30 }
 0xccc   :  { %2020 = vmatpush3.bf16.msra.mxu0 %v2378_v47  ;;  %2023 = vmatprep.mubr.msk.bf16.mxu0 %vm2146_vm0, %v2145_v1 }
 0xccd   :  { %2021 = vmatprep.subr.bf16.mxu0 %v2145_v1 }
 0xcd0   :  { %2022 = vmatpush3.bf16.msra.mxu0 %v2390_v49 }
 0xd9e   :  { %v1542_v31 = vpop.f32.mrb[20].mxu0 }
 0xd9f   :  { %v1548_v32 = vadd.f32 %v1542_v31, %v1500_v20  ;;  %v2009_v33 = vpop.f32.mrb[21].mxu0 }
 0xda0   :  { %v1545_v34 = vpop.f32.mrb[22].mxu0 }
 0xda1   :  { %v1874_v38 = vmul.f32 -1.442695, %v1548_v32  ;;  %v2010_v39 = vpop.f32.mrb[23].mxu0 }
 0xda3   :  { %2089 = vpow2.f32 %v1874_v38 }
 0xda4   :  { %2091 = vtanh.f32 %v1548_v32 }
 0xdad   :  { %v2090_v40 = vpop.eup %2089 }
 0xdae   :  { %v1553_v43 = vadd.f32 1.0, %v2090_v40  ;;  %v2092_v52 = vpop.eup %2091 }
 0xdb0   :  { %2093 = vrcp.f32 %v1553_v43 }
 0xdba   :  { %v2094_v54 = vpop.eup %2093 }
 0xdbb   :  { %v1556_v55 = vsel %vm2510_vm14, %v2092_v52, %v2094_v54 }
 0xdbc   :  { %1559 = vrot.lane.b32.xlu1 %v1556_v55, %s2150_s6  ;;  %v1557_v45 = vmul.f32 %v1556_v55, %v1492_v3 }
 0xe2e   :  { %v1560_v60 = vpop.permute.xlu1 %1559 }
 0xe2f   :  { %v1562_v61 = vmul.f32 %v1560_v60, %v1556_v55 }
 0xe31   :  { %1564 = vrot.lane.b32.xlu0 %v1562_v61, %s2151_s0 }
 0xea3   :  { %v1565_v46 = vpop.permute.xlu0 %1564 }
 0xea4   :  { %v1567_v20 = vadd.f32 %v1565_v46, %v1557_v45 }
 0xea6   :  { %2095 = vtanh.f32 %v1567_v20 }
 0xeb0   :  { %v2096_v63 = vpop.eup %2095 }
 0xeb1   :  { %1570 = vrot.lane.b32.xlu1 %v2096_v63, %s2150_s6 }
 0xf23   :  { %v1571_v44 = vpop.permute.xlu1 %1570 }
 0xf24   :  { %v1573_v4 = vmul.f32 %v1571_v44, %v1556_v55 }
 0xf26   :  { %v1574_v5 = vadd.f32 %v1573_v4, %v1499_v27  ;;  %v1576_v6 = vpack.c.bf16 %v1573_v4, %v1573_v4 }
 0xf28   :  { %1578 = vrot.lane.b32.xlu0 %v1576_v6, %s2151_s0 }
 0xf9a   :  { %v1579_v7 = vpop.permute.xlu0 %1578 }
 0xf9b   :  { %2016 = vmatmul.mubr.msk.bf16.vlgmr.msra.gmra.mrb[20].mxu1 %vm260_vm9, %v1579_v7 }
 0xf9c   :  { %2028 = vmatpush3.bf16.msra.mxu1 %v2378_v47  ;;  %2031 = vmatprep.mubr.msk.bf16.mxu1 %vm2146_vm0, %v2145_v1  ;;  %vm1810_vm0 = vcmask 779264  }
 0xf9d   :  { %2029 = vmatprep.subr.bf16.mxu1 %v2145_v1 }
 0xfa0   :  { %2030 = vmatpush3.bf16.msra.mxu1 %v2390_v49 }
0x106e   :  { %v1617_v8 = vpop.f32.mrb[20].mxu1 }
0x106f   :  { %v1623_v13 = vadd.f32 %v1617_v8, %v1575_v50  ;;  %v2017_v14 = vpop.f32.mrb[21].mxu1 }
0x1070   :  { %v1620_v16 = vpop.f32.mrb[22].mxu1 }
0x1071   :  { %v1876_v17 = vmul.f32 -1.442695, %v1623_v13  ;;  %v2018_v15 = vpop.f32.mrb[23].mxu1 }
0x1073   :  { %2097 = vpow2.f32 %v1876_v17 }
0x1074   :  { %2099 = vtanh.f32 %v1623_v13 }
0x107d   :  { %v2098_v47 = vpop.eup %2097 }
0x107e   :  { %v1628_v56 = vadd.f32 1.0, %v2098_v47  ;;  %v2100_v57 = vpop.eup %2099 }
0x1080   :  { %2101 = vrcp.f32 %v1628_v56 }
0x108a   :  { %v2102_v1 = vpop.eup %2101 }
0x108b   :  { %v1631_v49 = vsel %vm2510_vm14, %v2100_v57, %v2102_v1 }
0x108c   :  { %1634 = vrot.lane.b32.xlu1 %v1631_v49, %s2150_s6  ;;  %v1632_v41 = vmul.f32 %v1631_v49, %v1567_v20 }
0x10fe   :  { %v1635_v19 = vpop.permute.xlu1 %1634 }
0x10ff   :  { %v1637_v10 = vmul.f32 %v1635_v19, %v1631_v49 }
0x1101   :  { %1639 = vrot.lane.b32.xlu0 %v1637_v10, %s2151_s0 }
0x1173   :  { %v1640_v42 = vpop.permute.xlu0 %1639 }
0x1174   :  { %v1642_v50 = vadd.f32 %v1640_v42, %v1632_v41 }
0x1176   :  { %2103 = vtanh.f32 %v1642_v50 }
0x1180   :  { %v2104_v12 = vpop.eup %2103 }
0x1181   :  { %1645 = vrot.lane.b32.xlu1 %v2104_v12, %s2150_s6 }
0x11f3   :  { %v1646_v18 = vpop.permute.xlu1 %1645 }
0x11f4   :  { %v1648_v62 = vmul.f32 %v1646_v18, %v1631_v49 }
0x11f6   :  { %v1649_v21 = vadd.f32 %v1648_v62, %v1574_v5  ;;  %v1651_v0 = vpack.c.bf16 %v1648_v62, %v1648_v62 }
0x11f8   :  { %1653 = vrot.lane.b32.xlu0 %v1651_v0, %s2151_s0 }
0x126a   :  { %v1654_v22 = vpop.permute.xlu0 %1653 }
0x126b   :  { %2024 = vmatmul.mubr.msk.bf16.vlgmr.msra.gmra.mrb[24].mxu0 %vm260_vm9, %v1654_v22 }
0x133e   :  { %v1692_v2 = vpop.f32.mrb[24].mxu0 }
0x133f   :  { %v1698_v24 = vadd.f32 %v1692_v2, %v1650_v51  ;;  %v2025_v48 = vpop.f32.mrb[25].mxu0 }
0x1340   :  { %v1695_v25 = vpop.f32.mrb[26].mxu0 }
0x1341   :  { %v1878_v3 = vmul.f32 -1.442695, %v1698_v24  ;;  %v2026_v26 = vpop.f32.mrb[27].mxu0 }
0x1343   :  { %2105 = vpow2.f32 %v1878_v3 }
0x1344   :  { %2107 = vtanh.f32 %v1698_v24 }
0x134d   :  { %v2106_v11 = vpop.eup %2105 }
0x134e   :  { %v1703_v9 = vadd.f32 1.0, %v2106_v11  ;;  %v2108_v27 = vpop.eup %2107 }
0x1350   :  { %2109 = vrcp.f32 %v1703_v9 }
0x135a   :  { %v2110_v28 = vpop.eup %2109 }
0x135b   :  { %v1706_v30 = vsel %vm2510_vm14, %v2108_v27, %v2110_v28 }
0x135c   :  { %1709 = vrot.lane.b32.xlu1 %v1706_v30, %s2150_s6  ;;  %v1707_v29 = vmul.f32 %v1706_v30, %v1642_v50 }
0x13ce   :  { %v1710_v31 = vpop.permute.xlu1 %1709 }
0x13cf   :  { %v1712_v32 = vmul.f32 %v1710_v31, %v1706_v30 }
0x13d1   :  { %1714 = vrot.lane.b32.xlu0 %v1712_v32, %s2151_s0 }
0x1443   :  { %v1715_v37 = vpop.permute.xlu0 %1714 }
0x1444   :  { %v1717_v51 = vadd.f32 %v1715_v37, %v1707_v29 }
0x1446   :  { %2111 = vtanh.f32 %v1717_v51 }
0x1450   :  { %v2112_v33 = vpop.eup %2111 }
0x1451   :  { %1720 = vrot.lane.b32.xlu1 %v2112_v33, %s2150_s6 }
0x14c3   :  { %v1721_v34 = vpop.permute.xlu1 %1720 }
0x14c4   :  { %v1723_v38 = vmul.f32 %v1721_v34, %v1706_v30 }
0x14c6   :  { %v1724_v39 = vadd.f32 %v1723_v38, %v1649_v21  ;;  %v1726_v40 = vpack.c.bf16 %v1723_v38, %v1723_v38 }
0x14c8   :  { %1728 = vrot.lane.b32.xlu0 %v1726_v40, %s2151_s0 }
0x153a   :  { %v1729_v43 = vpop.permute.xlu0 %1728 }
0x153b   :  { %2032 = vmatmul.mubr.msk.bf16.vlgmr.msra.gmra.mrb[24].mxu1 %vm260_vm9, %v1729_v43 }
0x160e   :  { %v1767_v52 = vpop.f32.mrb[24].mxu1 }
0x160f   :  { %v1773_v54 = vadd.f32 %v1767_v52, %v1725_v53  ;;  %v2033_v55 = vpop.f32.mrb[25].mxu1 }
0x1610   :  { %v1770_v60 = vpop.f32.mrb[26].mxu1 }
0x1611   :  { %v1880_v61 = vmul.f32 -1.442695, %v1773_v54  ;;  %v2034_v45 = vpop.f32.mrb[27].mxu1 }
0x1613   :  { %2113 = vpow2.f32 %v1880_v61 }
0x1614   :  { %2115 = vtanh.f32 %v1773_v54 }
0x161d   :  { %v2114_v46 = vpop.eup %2113 }
0x161e   :  { %v1778_v20 = vadd.f32 1.0, %v2114_v46  ;;  %v2116_v63 = vpop.eup %2115 }
0x1620   :  { %2117 = vrcp.f32 %v1778_v20 }
0x162a   :  { %v2118_v44 = vpop.eup %2117 }
0x162b   :  { %v1781_v4 = vsel %vm2510_vm14, %v2116_v63, %v2118_v44 }
0x162c   :  { %1784 = vrot.lane.b32.xlu1 %v1781_v4, %s2150_s6  ;;  %v1782_v35 = vmul.f32 %v1781_v4, %v1717_v51 }
0x169e   :  { %v1785_v23 = vpop.permute.xlu1 %1784 }
0x169f   :  { %v1787_v5 = vmul.f32 %v1785_v23, %v1781_v4 }
0x16a1   :  { %1789 = vrot.lane.b32.xlu0 %v1787_v5, %s2151_s0 }
0x1713   :  { %v1790_v36 = vpop.permute.xlu0 %1789 }
0x1714   :  { %v1792_v53 = vadd.f32 %v1790_v36, %v1782_v35 }
0x1716   :  { %2119 = vtanh.f32 %v1792_v53 }
0x1720   :  { %v2120_v6 = vpop.eup %2119 }
0x1721   :  { %1795 = vrot.lane.b32.xlu1 %v2120_v6, %s2150_s6 }
0x1793   :  { %v1796_v7 = vpop.permute.xlu1 %1795 }
0x1794   :  { %v1798_v8 = vmul.f32 %v1796_v7, %v1781_v4 }
0x1796   :  { %v1799_v13 = vadd.f32 %v1798_v8, %v1724_v39 }
0x1798   :  { %1805 = vrot.lane.b32.xlu0 %v1799_v13, %s2148_s19 }
0x180a   :  { %v1806_v59 = vpop.permute.xlu0 %1805 }
0x180b   :  { %v1809_v14 = vsel %vm1808_vm15, %v2443_v58, %v1806_v59 }
0x180c   :  { %1811 = vst.msk [vmem:[#allocation2] sm:$0x3] %vm1810_vm0, %v1809_v14 }
0x180d   :  { %2132 = shalt.err (!%p2129_p4)
}
0x180e   :  { %s2133_s17 = scalar_lea.hbm %s2652_s7, 32 }
0x180f   :  { %p2134_p5 = scmp.ne.s32.totalorder %s2652_s7, %s2133_s17  ;;  %p2137_p6 = scmp.lt.u32.totalorder %s2133_s17, %s2652_s7 }
0x1811   :  { %p2139_p7 = pnand %p2137_p6, %p2134_p5 }
0x1813   :  { %2142 = shalt.err (!%p2139_p7)
}
0x1814   :  { %1821 = dma.vmem_to_hbm [thread:$0]  %s1819_s13, 32, %s2652_s7, [#allocation3]  }
0x1815   :  { %2143 = dma.done.wait [#allocation3], 32  }
0x1816   :  { %2144 = vsyncadd [#allocation3], 4294967264 }
0x1817   :  { %1825 = vsyncpa [#allocation3], 1 }

</bundles_post_ra>
